<compile_context>
chip_gen: v7x
topology: tpu7x:2x2x1
jax: 0.10.0
libtpu: 0.0.40
codegen_flags: <defaults>
</compile_context>

<pallas_src>
import functools

import jax
import jax.numpy as jnp
from jax.experimental import pallas as pl
from jax.experimental.pallas import tpu as pltpu

EPS = 1e-5
LEAKY_SLOPE = 0.01  # PyTorch nn.LeakyReLU default


def _round_up(v, m):
    return (v + m - 1) // m * m


# ---------------------------------------------------------------------------
# Fused Pallas kernel: full encoder+decoder stack, one grid step, all VMEM-resident.
# Activations are a (N*H, W*C padded to 128k) slab; lanes are (w, c) with c fastest.
# Each layer: one bf16 GEMM against banded weights (k row-taps fused along the GEMM N dim),
# static row-shift accumulation, then training-mode BatchNorm + activation in f32.
# ---------------------------------------------------------------------------
def _build_fused_kernel(n_batch, metas):
    def kernel(*refs):
        x_ref, o_ref = refs[0], refs[-1]
        x = x_ref[...]                                   # (N*H0, L0_pad) f32

        for li, m in enumerate(metas):
            wb_ref, p_ref, g_ref, b_ref = refs[1 + 4 * li: 5 + 4 * li]
            k, hin, hout, lp = m["k"], m["hin"], m["hout"], m["lout_pad"]

            # --- conv / transposed conv: ONE bf16 GEMM over the whole batch (M = N*Hin).
            # RHS columns are the k per-kh banded matrices concatenated (lane-tile aligned).
            t = jnp.dot(x.astype(jnp.bfloat16), wb_ref[...],
                        preferred_element_type=jnp.float32)          # (N*hin, k*lp)

            # --- row-tap accumulation: static sublane slices (encoder) / zero-row pads
            # (decoder). No sel matmuls. The per-image loop is only this cheap slicing
            # (the GEMM above already covers the whole batch); fine at toy batch sizes.
            per_image = []
            for img in range(n_batch):
                r0 = img * hin
                y_n = None
                for kh in range(k):
                    cols = slice(kh * lp, (kh + 1) * lp)             # lp % 128 == 0
                    if m["transpose"]:
                        c = t[r0:r0 + hin, cols]
                        top, bot = kh, k - 1 - kh
                        pieces = []
                        if top:
                            pieces.append(jnp.zeros((top, lp), jnp.float32))
                        pieces.append(c)
                        if bot:
                            pieces.append(jnp.zeros((bot, lp), jnp.float32))
                        if len(pieces) > 1:
                            c = jnp.concatenate(pieces, axis=0)
                    else:
                        c = t[r0 + kh:r0 + kh + hout, cols]
                    y_n = c if y_n is None else y_n + c
                per_image.append(y_n)
            acc = per_image[0] if n_batch == 1 else jnp.concatenate(per_image, axis=0)

            # --- BatchNorm2d (training semantics, biased variance), f32 throughout.
            # Per-channel reduce+broadcast via the host-precomputed projector P
            # (P[l1,l2] = 1/count if channel(l1)==channel(l2) and both lanes are real, else 0).
            stats = jnp.concatenate(
                [jnp.sum(acc, axis=0, keepdims=True),
                 jnp.sum(acc * acc, axis=0, keepdims=True)], axis=0)  # (2, lp)
            red = jnp.dot(stats, p_ref[...], preferred_element_type=jnp.float32)
            mean_l = red[0:1, :]
            var_l = jnp.maximum(red[1:2, :] - mean_l * mean_l, 0.0)   # clamp: no negative var
            scale_l = g_ref[...] * jax.lax.rsqrt(var_l + EPS)         # zero at pad lanes
            shift_l = b_ref[...] - mean_l * scale_l                   # zero at pad lanes
            z = acc * scale_l + shift_l
            if m["act"] == "relu":
                x = jnp.maximum(z, 0.0)
            else:  # LeakyReLU
                x = jnp.where(z > 0, z, LEAKY_SLOPE * z)

        o_ref[...] = x

    return kernel


# ---------------------------------------------------------------------------
# Wrapper-side weight preprocessing: banded (Toeplitz-in-W) matrices, the k row taps fused
# along the output-column axis, rows/cols zero-padded to the lane-padded widths, cast to bf16.
#   conv:   m[kh][(wi*Cin+ci), (wo*Cout+co)] = w[co, ci, kh, wi-wo]    (0 <= wi-wo < k)
#   convT:  m[kh][(wi*Cin+ci), (wo*Cout+co)] = w[ci, co, kh, wo-wi]    (0 <= wo-wi < k)
# ---------------------------------------------------------------------------
def _banded_conv_weights(w, w_in, k, lin_pad, lout_pad):
    # PyTorch Conv2d weight: (Cout, Cin, KH, KW), VALID conv.
    w = w.astype(jnp.float32)
    cout, cin = w.shape[0], w.shape[1]
    w_out = w_in - k + 1
    chunks = []
    for kh in range(k):
        m = jnp.zeros((w_in * cin, w_out * cout), jnp.float32)
        for kw in range(k):
            m = m + jnp.kron(jnp.eye(w_in, w_out, k=-kw, dtype=jnp.float32),
                             w[:, :, kh, kw].T)
        m = jnp.pad(m, ((0, lin_pad - w_in * cin), (0, lout_pad - w_out * cout)))
        chunks.append(m)
    return jnp.concatenate(chunks, axis=1).astype(jnp.bfloat16)   # (Lin_pad, k*Lout_pad)


def _banded_convt_weights(w, w_in, k, lin_pad, lout_pad):
    # PyTorch ConvTranspose2d weight: (Cin, Cout, KH, KW), stride 1, no padding.
    w = w.astype(jnp.float32)
    cin, cout = w.shape[0], w.shape[1]
    w_out = w_in + k - 1
    chunks = []
    for kh in range(k):
        m = jnp.zeros((w_in * cin, w_out * cout), jnp.float32)
        for kw in range(k):
            m = m + jnp.kron(jnp.eye(w_in, w_out, k=kw, dtype=jnp.float32),
                             w[:, :, kh, kw])
        m = jnp.pad(m, ((0, lin_pad - w_in * cin), (0, lout_pad - w_out * cout)))
        chunks.append(m)
    return jnp.concatenate(chunks, axis=1).astype(jnp.bfloat16)   # (Lin_pad, k*Lout_pad)


def _channel_projector(w_out, cout, lout_pad, cnt):
    # Channel-averaging projector with 1/count folded in; zero rows/cols at pad lanes.
    lout = w_out * cout
    lane = jnp.arange(lout_pad, dtype=jnp.int32)
    ch = jnp.where(lane < lout, lane % cout, -1)
    p = (ch[:, None] == ch[None, :]) & (ch[:, None] >= 0)
    return p.astype(jnp.float32) * (1.0 / float(cnt))


def _per_channel_to_lanes(vec_c, w_out, cout, lout_pad):
    # Broadcast a per-channel vector to the (w, c)-lane layout; zeros at pad lanes.
    v = jnp.tile(vec_c.reshape(-1).astype(jnp.float32), w_out)    # lane = w*cout + c
    v = jnp.pad(v, (0, lout_pad - w_out * cout))
    return v.reshape(1, lout_pad)


def autoencoder_forward(params, x_nchw, k):
    x = jnp.transpose(x_nchw, (0, 2, 3, 1)).astype(jnp.float32)   # NCHW -> NHWC
    n, h, w, c = x.shape
    lin_pad = _round_up(w * c, 128)
    x2 = jnp.pad(x.reshape(n * h, w * c), ((0, 0), (0, lin_pad - w * c)))   # (N*H, L0_pad)

    layers = ([("enc", p) for p in params["enc"]] +
              [("dec", p) for p in params["dec"]])

    metas, operands = [], []
    h_cur, w_cur, c_cur = h, w, c
    for kind, p in layers:
        if kind == "enc":
            cout = p["w"].shape[0]
            h_out, w_out = h_cur - k + 1, w_cur - k + 1
            lout_pad = _round_up(w_out * cout, 128)
            wb = _banded_conv_weights(p["w"], w_cur, k, lin_pad, lout_pad)
            transpose, act = False, "leaky"
        else:
            cout = p["w"].shape[1]
            h_out, w_out = h_cur + k - 1, w_cur + k - 1
            lout_pad = _round_up(w_out * cout, 128)
            wb = _banded_convt_weights(p["w"], w_cur, k, lin_pad, lout_pad)
            transpose, act = True, "relu"
        cnt = n * h_out * w_out                                   # elements per channel
        operands += [wb,
                     _channel_projector(w_out, cout, lout_pad, cnt),
                     _per_channel_to_lanes(p["gamma"], w_out, cout, lout_pad),
                     _per_channel_to_lanes(p["beta"], w_out, cout, lout_pad)]
        metas.append(dict(k=k, hin=h_cur, hout=h_out, lout_pad=lout_pad,
                          transpose=transpose, act=act))
        h_cur, w_cur, c_cur, lin_pad = h_out, w_out, cout, lout_pad

    kernel = _build_fused_kernel(n, metas)
    out_shape = jax.ShapeDtypeStruct((n * h_cur, lin_pad), jnp.float32)

    y = pl.pallas_call(
        kernel,
        out_shape=out_shape,
        grid=(1,),
        in_specs=[pl.BlockSpec(a.shape, lambda i: (0, 0)) for a in [x2] + operands],
        out_specs=pl.BlockSpec(out_shape.shape, lambda i: (0, 0)),
        compiler_params=pltpu.CompilerParams(dimension_semantics=("arbitrary",)),
    )(x2, *operands)

    y = y[:, : w_cur * c_cur].reshape(n, h_cur, w_cur, c_cur)
    return jnp.transpose(y, (0, 3, 1, 2))                         # back to NCHW


# ---------------------------------------------------------------------------
# Parameter construction (deterministic, in-script). Conv/ConvT bias omitted: training-mode
# BatchNorm cancels it exactly, so it is dead compute.
# ---------------------------------------------------------------------------
def init_autoencoder_params(key, hidden, k):
    enc, dec = [], []
    for i in range(len(hidden) - 1):
        cin, cout = hidden[i], hidden[i + 1]
        key, k1, k2, k3 = jax.random.split(key, 4)
        enc.append({
            "w": 0.1 * jax.random.normal(k1, (cout, cin, k, k), jnp.float32),
            "gamma": 1.0 + 0.1 * jax.random.normal(k2, (cout,), jnp.float32),
            "beta": 0.05 * jax.random.normal(k3, (cout,), jnp.float32),
        })
    for i in range(len(hidden) - 1, 0, -1):
        cin, cout = hidden[i], hidden[i - 1]
        key, k1, k2, k3 = jax.random.split(key, 4)
        dec.append({
            "w": 0.1 * jax.random.normal(k1, (cin, cout, k, k), jnp.float32),
            "gamma": 1.0 + 0.1 * jax.random.normal(k2, (cout,), jnp.float32),
            "beta": 0.05 * jax.random.normal(k3, (cout,), jnp.float32),
        })
    return {"enc": enc, "dec": dec}


# ---------------------------------------------------------------------------
# Pure-XLA reference with the SAME mixed precision (bf16 matmul operands, f32 accumulation and
# f32 BN/activations), so the comparison isolates structural bugs (row shifts, band
# construction, BN grouping) from expected bf16 rounding. Tolerance is ~5x tighter than before.
# ---------------------------------------------------------------------------
def _reference_forward(params, x_nchw, k):
    x = jnp.transpose(x_nchw, (0, 2, 3, 1)).astype(jnp.float32)

    def conv(x, wk, padding):
        return jax.lax.conv_general_dilated(
            x.astype(jnp.bfloat16), wk.astype(jnp.bfloat16), (1, 1), padding,
            dimension_numbers=("NHWC", "HWIO", "NHWC"),
            preferred_element_type=jnp.float32)

    def bn_act(y, gamma, beta, leaky):
        mean = jnp.mean(y, axis=(0, 1, 2), keepdims=True)
        var = jnp.mean(jnp.square(y - mean), axis=(0, 1, 2), keepdims=True)
        z = (y - mean) * jax.lax.rsqrt(var + EPS)
        z = z * gamma.reshape(1, 1, 1, -1) + beta.reshape(1, 1, 1, -1)
        return jnp.where(z > 0, z, LEAKY_SLOPE * z) if leaky else jnp.maximum(z, 0.0)

    for p in params["enc"]:
        wk = jnp.transpose(p["w"], (2, 3, 1, 0))                       # HWIO
        x = bn_act(conv(x, wk, "VALID"), p["gamma"], p["beta"], leaky=True)
    for p in params["dec"]:
        wk = jnp.transpose(p["w"][:, :, ::-1, ::-1], (2, 3, 0, 1))     # flipped, HWIO
        x = bn_act(conv(x, wk, [(k - 1, k - 1), (k - 1, k - 1)]),
                   p["gamma"], p["beta"], leaky=False)
    return jnp.transpose(x, (0, 3, 1, 2))


if __name__ == "__main__":
    hidden = [4, 8, 16]
    kernel_size = 3
    batch, spatial = 2, 16

    key = jax.random.PRNGKey(0)
    key, pkey, xkey = jax.random.split(key, 3)
    params = init_autoencoder_params(pkey, hidden, kernel_size)
    x = jax.random.normal(xkey, (batch, hidden[0], spatial, spatial), jnp.float32)

    fwd = jax.jit(functools.partial(autoencoder_forward, k=kernel_size))
    y = fwd(params, x)
    jax.block_until_ready(y)

    assert y.shape == (batch, hidden[0], spatial, spatial), y.shape
    assert bool(jnp.all(jnp.isfinite(y)))

    # Precision-matched reference (bf16 matmul operands on both sides): remaining differences
    # are accumulation order + one-pass-vs-two-pass BN variance only.
    y_ref = jax.jit(functools.partial(_reference_forward, k=kernel_size))(params, x)
    max_err = float(jnp.max(jnp.abs(y - y_ref)))
    assert max_err < 3e-2, f"mismatch vs reference: max abs err {max_err}"

    print("KERNEL_OK")
</pallas_src>

<mosaic_0001>
module attributes {stable_mosaic.version = 11 : i64} {
  func.func @kernel(%arg0: i32, %arg1: memref<32x128xf32, #tpu.memory_space<vmem>>, %arg2: memref<128x384xbf16, #tpu.memory_space<vmem>>, %arg3: memref<128x128xf32, #tpu.memory_space<vmem>>, %arg4: memref<1x128xf32, #tpu.memory_space<vmem>>, %arg5: memref<1x128xf32, #tpu.memory_space<vmem>>, %arg6: memref<128x768xbf16, #tpu.memory_space<vmem>>, %arg7: memref<256x256xf32, #tpu.memory_space<vmem>>, %arg8: memref<1x256xf32, #tpu.memory_space<vmem>>, %arg9: memref<1x256xf32, #tpu.memory_space<vmem>>, %arg10: memref<256x384xbf16, #tpu.memory_space<vmem>>, %arg11: memref<128x128xf32, #tpu.memory_space<vmem>>, %arg12: memref<1x128xf32, #tpu.memory_space<vmem>>, %arg13: memref<1x128xf32, #tpu.memory_space<vmem>>, %arg14: memref<128x384xbf16, #tpu.memory_space<vmem>>, %arg15: memref<128x128xf32, #tpu.memory_space<vmem>>, %arg16: memref<1x128xf32, #tpu.memory_space<vmem>>, %arg17: memref<1x128xf32, #tpu.memory_space<vmem>>, %arg18: memref<32x128xf32, #tpu.memory_space<vmem>>) attributes {dimension_semantics = [#tpu.dimension_semantics<arbitrary>], iteration_bounds = array<i64: 1>, scalar_prefetch = 0 : i64, scratch_operands = 0 : i64, tpu.core_type = #tpu.core_type<tc>, window_params = [{pipeline_mode = #tpu.pipeline_mode<synchronous>, transform_indices = @transform_0, window_bounds = array<i64: 32, 128>}, {pipeline_mode = #tpu.pipeline_mode<synchronous>, transform_indices = @transform_1, window_bounds = array<i64: 128, 384>}, {pipeline_mode = #tpu.pipeline_mode<synchronous>, transform_indices = @transform_2, window_bounds = array<i64: 128, 128>}, {pipeline_mode = #tpu.pipeline_mode<synchronous>, transform_indices = @transform_3, window_bounds = array<i64: 1, 128>}, {pipeline_mode = #tpu.pipeline_mode<synchronous>, transform_indices = @transform_4, window_bounds = array<i64: 1, 128>}, {pipeline_mode = #tpu.pipeline_mode<synchronous>, transform_indices = @transform_5, window_bounds = array<i64: 128, 768>}, {pipeline_mode = #tpu.pipeline_mode<synchronous>, transform_indices = @transform_6, window_bounds = array<i64: 256, 256>}, {pipeline_mode = #tpu.pipeline_mode<synchronous>, transform_indices = @transform_7, window_bounds = array<i64: 1, 256>}, {pipeline_mode = #tpu.pipeline_mode<synchronous>, transform_indices = @transform_8, window_bounds = array<i64: 1, 256>}, {pipeline_mode = #tpu.pipeline_mode<synchronous>, transform_indices = @transform_9, window_bounds = array<i64: 256, 384>}, {pipeline_mode = #tpu.pipeline_mode<synchronous>, transform_indices = @transform_10, window_bounds = array<i64: 128, 128>}, {pipeline_mode = #tpu.pipeline_mode<synchronous>, transform_indices = @transform_11, window_bounds = array<i64: 1, 128>}, {pipeline_mode = #tpu.pipeline_mode<synchronous>, transform_indices = @transform_12, window_bounds = array<i64: 1, 128>}, {pipeline_mode = #tpu.pipeline_mode<synchronous>, transform_indices = @transform_13, window_bounds = array<i64: 128, 384>}, {pipeline_mode = #tpu.pipeline_mode<synchronous>, transform_indices = @transform_14, window_bounds = array<i64: 128, 128>}, {pipeline_mode = #tpu.pipeline_mode<synchronous>, transform_indices = @transform_15, window_bounds = array<i64: 1, 128>}, {pipeline_mode = #tpu.pipeline_mode<synchronous>, transform_indices = @transform_16, window_bounds = array<i64: 1, 128>}, {pipeline_mode = #tpu.pipeline_mode<synchronous>, transform_indices = @transform_17, window_bounds = array<i64: 32, 128>}]} {
    %c0 = arith.constant 0 : index
    %c0_0 = arith.constant 0 : index
    %0 = vector.load %arg1[%c0, %c0_0] : memref<32x128xf32, #tpu.memory_space<vmem>>, vector<32x128xf32>
    %1 = arith.truncf %0 : vector<32x128xf32> to vector<32x128xbf16>
    %c0_1 = arith.constant 0 : index
    %c0_2 = arith.constant 0 : index
    %2 = vector.load %arg2[%c0_1, %c0_2] : memref<128x384xbf16, #tpu.memory_space<vmem>>, vector<128x384xbf16>
    %cst = arith.constant dense<0.000000e+00> : vector<32x384xf32>
    %3 = tpu.matmul %1, %2, %cst {dimension_numbers = #tpu.dot_dimension_numbers<[1], [0], [0], [1], [0, 0, 1, 1], [], []>} : vector<32x128xbf16>, vector<128x384xbf16>, vector<32x384xf32> -> vector<32x384xf32>
    %4 = vector.extract_strided_slice %3 {offsets = [0, 0], sizes = [14, 128], strides = [1, 1]} : vector<32x384xf32> to vector<14x128xf32>
    %5 = vector.extract_strided_slice %3 {offsets = [1, 128], sizes = [14, 128], strides = [1, 1]} : vector<32x384xf32> to vector<14x128xf32>
    %6 = arith.addf %4, %5 : vector<14x128xf32>
    %7 = vector.extract_strided_slice %3 {offsets = [2, 256], sizes = [14, 128], strides = [1, 1]} : vector<32x384xf32> to vector<14x128xf32>
    %8 = arith.addf %6, %7 : vector<14x128xf32>
    %9 = vector.extract_strided_slice %3 {offsets = [16, 0], sizes = [14, 128], strides = [1, 1]} : vector<32x384xf32> to vector<14x128xf32>
    %10 = vector.extract_strided_slice %3 {offsets = [17, 128], sizes = [14, 128], strides = [1, 1]} : vector<32x384xf32> to vector<14x128xf32>
    %11 = arith.addf %9, %10 : vector<14x128xf32>
    %12 = vector.extract_strided_slice %3 {offsets = [18, 256], sizes = [14, 128], strides = [1, 1]} : vector<32x384xf32> to vector<14x128xf32>
    %13 = arith.addf %11, %12 : vector<14x128xf32>
    %14 = tpu.concatenate %8, %13 in 0 : vector<14x128xf32>, vector<14x128xf32> -> vector<28x128xf32>
    %cst_3 = arith.constant dense<0.000000e+00> : vector<128xf32>
    %15 = vector.multi_reduction <add>, %14, %cst_3 [0] : vector<28x128xf32> to vector<128xf32>
    %16 = vector.shape_cast %15 : vector<128xf32> to vector<1x128xf32>
    %17 = arith.mulf %14, %14 : vector<28x128xf32>
    %cst_4 = arith.constant dense<0.000000e+00> : vector<128xf32>
    %18 = vector.multi_reduction <add>, %17, %cst_4 [0] : vector<28x128xf32> to vector<128xf32>
    %19 = vector.shape_cast %18 : vector<128xf32> to vector<1x128xf32>
    %20 = tpu.concatenate %16, %19 in 0 : vector<1x128xf32>, vector<1x128xf32> -> vector<2x128xf32>
    %c0_5 = arith.constant 0 : index
    %c0_6 = arith.constant 0 : index
    %21 = vector.load %arg3[%c0_5, %c0_6] : memref<128x128xf32, #tpu.memory_space<vmem>>, vector<128x128xf32>
    %cst_7 = arith.constant dense<0.000000e+00> : vector<2x128xf32>
    %22 = tpu.matmul %20, %21, %cst_7 {dimension_numbers = #tpu.dot_dimension_numbers<[1], [0], [0], [1], [0, 0, 1, 1], [], []>} : vector<2x128xf32>, vector<128x128xf32>, vector<2x128xf32> -> vector<2x128xf32>
    %23 = vector.extract_strided_slice %22 {offsets = [0, 0], sizes = [1, 128], strides = [1, 1]} : vector<2x128xf32> to vector<1x128xf32>
    %24 = vector.extract_strided_slice %22 {offsets = [1, 0], sizes = [1, 128], strides = [1, 1]} : vector<2x128xf32> to vector<1x128xf32>
    %25 = arith.mulf %23, %23 : vector<1x128xf32>
    %26 = arith.subf %24, %25 : vector<1x128xf32>
    %cst_8 = arith.constant 0.000000e+00 : f32
    %27 = vector.broadcast %cst_8 : f32 to vector<1x128xf32>
    %28 = arith.maximumf %26, %27 : vector<1x128xf32>
    %c0_9 = arith.constant 0 : index
    %c0_10 = arith.constant 0 : index
    %29 = vector.load %arg4[%c0_9, %c0_10] : memref<1x128xf32, #tpu.memory_space<vmem>>, vector<1x128xf32>
    %cst_11 = arith.constant 9.99999974E-6 : f32
    %30 = vector.broadcast %cst_11 : f32 to vector<1x128xf32>
    %31 = arith.addf %28, %30 : vector<1x128xf32>
    %32 = math.rsqrt %31 : vector<1x128xf32>
    %33 = arith.mulf %29, %32 : vector<1x128xf32>
    %c0_12 = arith.constant 0 : index
    %c0_13 = arith.constant 0 : index
    %34 = vector.load %arg5[%c0_12, %c0_13] : memref<1x128xf32, #tpu.memory_space<vmem>>, vector<1x128xf32>
    %35 = arith.mulf %23, %33 : vector<1x128xf32>
    %36 = arith.subf %34, %35 : vector<1x128xf32>
    %37 = vector.broadcast %33 : vector<1x128xf32> to vector<28x128xf32>
    %38 = arith.mulf %14, %37 : vector<28x128xf32>
    %39 = vector.broadcast %36 : vector<1x128xf32> to vector<28x128xf32>
    %40 = arith.addf %38, %39 : vector<28x128xf32>
    %cst_14 = arith.constant 0.000000e+00 : f32
    %41 = vector.broadcast %cst_14 : f32 to vector<28x128xf32>
    %42 = arith.cmpf ogt, %40, %41 : vector<28x128xf32>
    %cst_15 = arith.constant 0.00999999977 : f32
    %43 = vector.broadcast %cst_15 : f32 to vector<28x128xf32>
    %44 = arith.mulf %43, %40 : vector<28x128xf32>
    %45 = arith.select %42, %40, %44 : vector<28x128xi1>, vector<28x128xf32>
    %46 = arith.truncf %45 : vector<28x128xf32> to vector<28x128xbf16>
    %c0_16 = arith.constant 0 : index
    %c0_17 = arith.constant 0 : index
    %47 = vector.load %arg6[%c0_16, %c0_17] : memref<128x768xbf16, #tpu.memory_space<vmem>>, vector<128x768xbf16>
    %cst_18 = arith.constant dense<0.000000e+00> : vector<28x768xf32>
    %48 = tpu.matmul %46, %47, %cst_18 {dimension_numbers = #tpu.dot_dimension_numbers<[1], [0], [0], [1], [0, 0, 1, 1], [], []>} : vector<28x128xbf16>, vector<128x768xbf16>, vector<28x768xf32> -> vector<28x768xf32>
    %49 = vector.extract_strided_slice %48 {offsets = [0, 0], sizes = [12, 256], strides = [1, 1]} : vector<28x768xf32> to vector<12x256xf32>
    %50 = vector.extract_strided_slice %48 {offsets = [1, 256], sizes = [12, 256], strides = [1, 1]} : vector<28x768xf32> to vector<12x256xf32>
    %51 = arith.addf %49, %50 : vector<12x256xf32>
    %52 = vector.extract_strided_slice %48 {offsets = [2, 512], sizes = [12, 256], strides = [1, 1]} : vector<28x768xf32> to vector<12x256xf32>
    %53 = arith.addf %51, %52 : vector<12x256xf32>
    %54 = vector.extract_strided_slice %48 {offsets = [14, 0], sizes = [12, 256], strides = [1, 1]} : vector<28x768xf32> to vector<12x256xf32>
    %55 = vector.extract_strided_slice %48 {offsets = [15, 256], sizes = [12, 256], strides = [1, 1]} : vector<28x768xf32> to vector<12x256xf32>
    %56 = arith.addf %54, %55 : vector<12x256xf32>
    %57 = vector.extract_strided_slice %48 {offsets = [16, 512], sizes = [12, 256], strides = [1, 1]} : vector<28x768xf32> to vector<12x256xf32>
    %58 = arith.addf %56, %57 : vector<12x256xf32>
    %59 = tpu.concatenate %53, %58 in 0 : vector<12x256xf32>, vector<12x256xf32> -> vector<24x256xf32>
    %cst_19 = arith.constant dense<0.000000e+00> : vector<256xf32>
    %60 = vector.multi_reduction <add>, %59, %cst_19 [0] : vector<24x256xf32> to vector<256xf32>
    %61 = vector.shape_cast %60 : vector<256xf32> to vector<1x256xf32>
    %62 = arith.mulf %59, %59 : vector<24x256xf32>
    %cst_20 = arith.constant dense<0.000000e+00> : vector<256xf32>
    %63 = vector.multi_reduction <add>, %62, %cst_20 [0] : vector<24x256xf32> to vector<256xf32>
    %64 = vector.shape_cast %63 : vector<256xf32> to vector<1x256xf32>
    %65 = tpu.concatenate %61, %64 in 0 : vector<1x256xf32>, vector<1x256xf32> -> vector<2x256xf32>
    %c0_21 = arith.constant 0 : index
    %c0_22 = arith.constant 0 : index
    %66 = vector.load %arg7[%c0_21, %c0_22] : memref<256x256xf32, #tpu.memory_space<vmem>>, vector<256x256xf32>
    %cst_23 = arith.constant dense<0.000000e+00> : vector<2x256xf32>
    %67 = tpu.matmul %65, %66, %cst_23 {dimension_numbers = #tpu.dot_dimension_numbers<[1], [0], [0], [1], [0, 0, 1, 1], [], []>} : vector<2x256xf32>, vector<256x256xf32>, vector<2x256xf32> -> vector<2x256xf32>
    %68 = vector.extract_strided_slice %67 {offsets = [0, 0], sizes = [1, 256], strides = [1, 1]} : vector<2x256xf32> to vector<1x256xf32>
    %69 = vector.extract_strided_slice %67 {offsets = [1, 0], sizes = [1, 256], strides = [1, 1]} : vector<2x256xf32> to vector<1x256xf32>
    %70 = arith.mulf %68, %68 : vector<1x256xf32>
    %71 = arith.subf %69, %70 : vector<1x256xf32>
    %cst_24 = arith.constant 0.000000e+00 : f32
    %72 = vector.broadcast %cst_24 : f32 to vector<1x256xf32>
    %73 = arith.maximumf %71, %72 : vector<1x256xf32>
    %c0_25 = arith.constant 0 : index
    %c0_26 = arith.constant 0 : index
    %74 = vector.load %arg8[%c0_25, %c0_26] : memref<1x256xf32, #tpu.memory_space<vmem>>, vector<1x256xf32>
    %cst_27 = arith.constant 9.99999974E-6 : f32
    %75 = vector.broadcast %cst_27 : f32 to vector<1x256xf32>
    %76 = arith.addf %73, %75 : vector<1x256xf32>
    %77 = math.rsqrt %76 : vector<1x256xf32>
    %78 = arith.mulf %74, %77 : vector<1x256xf32>
    %c0_28 = arith.constant 0 : index
    %c0_29 = arith.constant 0 : index
    %79 = vector.load %arg9[%c0_28, %c0_29] : memref<1x256xf32, #tpu.memory_space<vmem>>, vector<1x256xf32>
    %80 = arith.mulf %68, %78 : vector<1x256xf32>
    %81 = arith.subf %79, %80 : vector<1x256xf32>
    %82 = vector.broadcast %78 : vector<1x256xf32> to vector<24x256xf32>
    %83 = arith.mulf %59, %82 : vector<24x256xf32>
    %84 = vector.broadcast %81 : vector<1x256xf32> to vector<24x256xf32>
    %85 = arith.addf %83, %84 : vector<24x256xf32>
    %cst_30 = arith.constant 0.000000e+00 : f32
    %86 = vector.broadcast %cst_30 : f32 to vector<24x256xf32>
    %87 = arith.cmpf ogt, %85, %86 : vector<24x256xf32>
    %cst_31 = arith.constant 0.00999999977 : f32
    %88 = vector.broadcast %cst_31 : f32 to vector<24x256xf32>
    %89 = arith.mulf %88, %85 : vector<24x256xf32>
    %90 = arith.select %87, %85, %89 : vector<24x256xi1>, vector<24x256xf32>
    %91 = arith.truncf %90 : vector<24x256xf32> to vector<24x256xbf16>
    %c0_32 = arith.constant 0 : index
    %c0_33 = arith.constant 0 : index
    %92 = vector.load %arg10[%c0_32, %c0_33] : memref<256x384xbf16, #tpu.memory_space<vmem>>, vector<256x384xbf16>
    %cst_34 = arith.constant dense<0.000000e+00> : vector<24x384xf32>
    %93 = tpu.matmul %91, %92, %cst_34 {dimension_numbers = #tpu.dot_dimension_numbers<[1], [0], [0], [1], [0, 0, 1, 1], [], []>} : vector<24x256xbf16>, vector<256x384xbf16>, vector<24x384xf32> -> vector<24x384xf32>
    %94 = vector.extract_strided_slice %93 {offsets = [0, 0], sizes = [12, 128], strides = [1, 1]} : vector<24x384xf32> to vector<12x128xf32>
    %cst_35 = arith.constant 0.000000e+00 : f32
    %95 = vector.broadcast %cst_35 : f32 to vector<2x128xf32>
    %96 = tpu.concatenate %94, %95 in 0 : vector<12x128xf32>, vector<2x128xf32> -> vector<14x128xf32>
    %97 = vector.extract_strided_slice %93 {offsets = [0, 128], sizes = [12, 128], strides = [1, 1]} : vector<24x384xf32> to vector<12x128xf32>
    %cst_36 = arith.constant 0.000000e+00 : f32
    %98 = vector.broadcast %cst_36 : f32 to vector<1x128xf32>
    %cst_37 = arith.constant 0.000000e+00 : f32
    %99 = vector.broadcast %cst_37 : f32 to vector<1x128xf32>
    %100 = tpu.concatenate %98, %97, %99 in 0 : vector<1x128xf32>, vector<12x128xf32>, vector<1x128xf32> -> vector<14x128xf32>
    %101 = arith.addf %96, %100 : vector<14x128xf32>
    %102 = vector.extract_strided_slice %93 {offsets = [0, 256], sizes = [12, 128], strides = [1, 1]} : vector<24x384xf32> to vector<12x128xf32>
    %cst_38 = arith.constant 0.000000e+00 : f32
    %103 = vector.broadcast %cst_38 : f32 to vector<2x128xf32>
    %104 = tpu.concatenate %103, %102 in 0 : vector<2x128xf32>, vector<12x128xf32> -> vector<14x128xf32>
    %105 = arith.addf %101, %104 : vector<14x128xf32>
    %106 = vector.extract_strided_slice %93 {offsets = [12, 0], sizes = [12, 128], strides = [1, 1]} : vector<24x384xf32> to vector<12x128xf32>
    %cst_39 = arith.constant 0.000000e+00 : f32
    %107 = vector.broadcast %cst_39 : f32 to vector<2x128xf32>
    %108 = tpu.concatenate %106, %107 in 0 : vector<12x128xf32>, vector<2x128xf32> -> vector<14x128xf32>
    %109 = vector.extract_strided_slice %93 {offsets = [12, 128], sizes = [12, 128], strides = [1, 1]} : vector<24x384xf32> to vector<12x128xf32>
    %cst_40 = arith.constant 0.000000e+00 : f32
    %110 = vector.broadcast %cst_40 : f32 to vector<1x128xf32>
    %cst_41 = arith.constant 0.000000e+00 : f32
    %111 = vector.broadcast %cst_41 : f32 to vector<1x128xf32>
    %112 = tpu.concatenate %110, %109, %111 in 0 : vector<1x128xf32>, vector<12x128xf32>, vector<1x128xf32> -> vector<14x128xf32>
    %113 = arith.addf %108, %112 : vector<14x128xf32>
    %114 = vector.extract_strided_slice %93 {offsets = [12, 256], sizes = [12, 128], strides = [1, 1]} : vector<24x384xf32> to vector<12x128xf32>
    %cst_42 = arith.constant 0.000000e+00 : f32
    %115 = vector.broadcast %cst_42 : f32 to vector<2x128xf32>
    %116 = tpu.concatenate %115, %114 in 0 : vector<2x128xf32>, vector<12x128xf32> -> vector<14x128xf32>
    %117 = arith.addf %113, %116 : vector<14x128xf32>
    %118 = tpu.concatenate %105, %117 in 0 : vector<14x128xf32>, vector<14x128xf32> -> vector<28x128xf32>
    %cst_43 = arith.constant dense<0.000000e+00> : vector<128xf32>
    %119 = vector.multi_reduction <add>, %118, %cst_43 [0] : vector<28x128xf32> to vector<128xf32>
    %120 = vector.shape_cast %119 : vector<128xf32> to vector<1x128xf32>
    %121 = arith.mulf %118, %118 : vector<28x128xf32>
    %cst_44 = arith.constant dense<0.000000e+00> : vector<128xf32>
    %122 = vector.multi_reduction <add>, %121, %cst_44 [0] : vector<28x128xf32> to vector<128xf32>
    %123 = vector.shape_cast %122 : vector<128xf32> to vector<1x128xf32>
    %124 = tpu.concatenate %120, %123 in 0 : vector<1x128xf32>, vector<1x128xf32> -> vector<2x128xf32>
    %c0_45 = arith.constant 0 : index
    %c0_46 = arith.constant 0 : index
    %125 = vector.load %arg11[%c0_45, %c0_46] : memref<128x128xf32, #tpu.memory_space<vmem>>, vector<128x128xf32>
    %cst_47 = arith.constant dense<0.000000e+00> : vector<2x128xf32>
    %126 = tpu.matmul %124, %125, %cst_47 {dimension_numbers = #tpu.dot_dimension_numbers<[1], [0], [0], [1], [0, 0, 1, 1], [], []>} : vector<2x128xf32>, vector<128x128xf32>, vector<2x128xf32> -> vector<2x128xf32>
    %127 = vector.extract_strided_slice %126 {offsets = [0, 0], sizes = [1, 128], strides = [1, 1]} : vector<2x128xf32> to vector<1x128xf32>
    %128 = vector.extract_strided_slice %126 {offsets = [1, 0], sizes = [1, 128], strides = [1, 1]} : vector<2x128xf32> to vector<1x128xf32>
    %129 = arith.mulf %127, %127 : vector<1x128xf32>
    %130 = arith.subf %128, %129 : vector<1x128xf32>
    %cst_48 = arith.constant 0.000000e+00 : f32
    %131 = vector.broadcast %cst_48 : f32 to vector<1x128xf32>
    %132 = arith.maximumf %130, %131 : vector<1x128xf32>
    %c0_49 = arith.constant 0 : index
    %c0_50 = arith.constant 0 : index
    %133 = vector.load %arg12[%c0_49, %c0_50] : memref<1x128xf32, #tpu.memory_space<vmem>>, vector<1x128xf32>
    %cst_51 = arith.constant 9.99999974E-6 : f32
    %134 = vector.broadcast %cst_51 : f32 to vector<1x128xf32>
    %135 = arith.addf %132, %134 : vector<1x128xf32>
    %136 = math.rsqrt %135 : vector<1x128xf32>
    %137 = arith.mulf %133, %136 : vector<1x128xf32>
    %c0_52 = arith.constant 0 : index
    %c0_53 = arith.constant 0 : index
    %138 = vector.load %arg13[%c0_52, %c0_53] : memref<1x128xf32, #tpu.memory_space<vmem>>, vector<1x128xf32>
    %139 = arith.mulf %127, %137 : vector<1x128xf32>
    %140 = arith.subf %138, %139 : vector<1x128xf32>
    %141 = vector.broadcast %137 : vector<1x128xf32> to vector<28x128xf32>
    %142 = arith.mulf %118, %141 : vector<28x128xf32>
    %143 = vector.broadcast %140 : vector<1x128xf32> to vector<28x128xf32>
    %144 = arith.addf %142, %143 : vector<28x128xf32>
    %cst_54 = arith.constant 0.000000e+00 : f32
    %145 = vector.broadcast %cst_54 : f32 to vector<28x128xf32>
    %146 = arith.maximumf %144, %145 : vector<28x128xf32>
    %147 = arith.truncf %146 : vector<28x128xf32> to vector<28x128xbf16>
    %c0_55 = arith.constant 0 : index
    %c0_56 = arith.constant 0 : index
    %148 = vector.load %arg14[%c0_55, %c0_56] : memref<128x384xbf16, #tpu.memory_space<vmem>>, vector<128x384xbf16>
    %cst_57 = arith.constant dense<0.000000e+00> : vector<28x384xf32>
    %149 = tpu.matmul %147, %148, %cst_57 {dimension_numbers = #tpu.dot_dimension_numbers<[1], [0], [0], [1], [0, 0, 1, 1], [], []>} : vector<28x128xbf16>, vector<128x384xbf16>, vector<28x384xf32> -> vector<28x384xf32>
    %150 = vector.extract_strided_slice %149 {offsets = [0, 0], sizes = [14, 128], strides = [1, 1]} : vector<28x384xf32> to vector<14x128xf32>
    %cst_58 = arith.constant 0.000000e+00 : f32
    %151 = vector.broadcast %cst_58 : f32 to vector<2x128xf32>
    %152 = tpu.concatenate %150, %151 in 0 : vector<14x128xf32>, vector<2x128xf32> -> vector<16x128xf32>
    %153 = vector.extract_strided_slice %149 {offsets = [0, 128], sizes = [14, 128], strides = [1, 1]} : vector<28x384xf32> to vector<14x128xf32>
    %cst_59 = arith.constant 0.000000e+00 : f32
    %154 = vector.broadcast %cst_59 : f32 to vector<1x128xf32>
    %cst_60 = arith.constant 0.000000e+00 : f32
    %155 = vector.broadcast %cst_60 : f32 to vector<1x128xf32>
    %156 = tpu.concatenate %154, %153, %155 in 0 : vector<1x128xf32>, vector<14x128xf32>, vector<1x128xf32> -> vector<16x128xf32>
    %157 = arith.addf %152, %156 : vector<16x128xf32>
    %158 = vector.extract_strided_slice %149 {offsets = [0, 256], sizes = [14, 128], strides = [1, 1]} : vector<28x384xf32> to vector<14x128xf32>
    %cst_61 = arith.constant 0.000000e+00 : f32
    %159 = vector.broadcast %cst_61 : f32 to vector<2x128xf32>
    %160 = tpu.concatenate %159, %158 in 0 : vector<2x128xf32>, vector<14x128xf32> -> vector<16x128xf32>
    %161 = arith.addf %157, %160 : vector<16x128xf32>
    %162 = vector.extract_strided_slice %149 {offsets = [14, 0], sizes = [14, 128], strides = [1, 1]} : vector<28x384xf32> to vector<14x128xf32>
    %cst_62 = arith.constant 0.000000e+00 : f32
    %163 = vector.broadcast %cst_62 : f32 to vector<2x128xf32>
    %164 = tpu.concatenate %162, %163 in 0 : vector<14x128xf32>, vector<2x128xf32> -> vector<16x128xf32>
    %165 = vector.extract_strided_slice %149 {offsets = [14, 128], sizes = [14, 128], strides = [1, 1]} : vector<28x384xf32> to vector<14x128xf32>
    %cst_63 = arith.constant 0.000000e+00 : f32
    %166 = vector.broadcast %cst_63 : f32 to vector<1x128xf32>
    %cst_64 = arith.constant 0.000000e+00 : f32
    %167 = vector.broadcast %cst_64 : f32 to vector<1x128xf32>
    %168 = tpu.concatenate %166, %165, %167 in 0 : vector<1x128xf32>, vector<14x128xf32>, vector<1x128xf32> -> vector<16x128xf32>
    %169 = arith.addf %164, %168 : vector<16x128xf32>
    %170 = vector.extract_strided_slice %149 {offsets = [14, 256], sizes = [14, 128], strides = [1, 1]} : vector<28x384xf32> to vector<14x128xf32>
    %cst_65 = arith.constant 0.000000e+00 : f32
    %171 = vector.broadcast %cst_65 : f32 to vector<2x128xf32>
    %172 = tpu.concatenate %171, %170 in 0 : vector<2x128xf32>, vector<14x128xf32> -> vector<16x128xf32>
    %173 = arith.addf %169, %172 : vector<16x128xf32>
    %174 = tpu.concatenate %161, %173 in 0 : vector<16x128xf32>, vector<16x128xf32> -> vector<32x128xf32>
    %cst_66 = arith.constant dense<0.000000e+00> : vector<128xf32>
    %175 = vector.multi_reduction <add>, %174, %cst_66 [0] : vector<32x128xf32> to vector<128xf32>
    %176 = vector.shape_cast %175 : vector<128xf32> to vector<1x128xf32>
    %177 = arith.mulf %174, %174 : vector<32x128xf32>
    %cst_67 = arith.constant dense<0.000000e+00> : vector<128xf32>
    %178 = vector.multi_reduction <add>, %177, %cst_67 [0] : vector<32x128xf32> to vector<128xf32>
    %179 = vector.shape_cast %178 : vector<128xf32> to vector<1x128xf32>
    %180 = tpu.concatenate %176, %179 in 0 : vector<1x128xf32>, vector<1x128xf32> -> vector<2x128xf32>
    %c0_68 = arith.constant 0 : index
    %c0_69 = arith.constant 0 : index
    %181 = vector.load %arg15[%c0_68, %c0_69] : memref<128x128xf32, #tpu.memory_space<vmem>>, vector<128x128xf32>
    %cst_70 = arith.constant dense<0.000000e+00> : vector<2x128xf32>
    %182 = tpu.matmul %180, %181, %cst_70 {dimension_numbers = #tpu.dot_dimension_numbers<[1], [0], [0], [1], [0, 0, 1, 1], [], []>} : vector<2x128xf32>, vector<128x128xf32>, vector<2x128xf32> -> vector<2x128xf32>
    %183 = vector.extract_strided_slice %182 {offsets = [0, 0], sizes = [1, 128], strides = [1, 1]} : vector<2x128xf32> to vector<1x128xf32>
    %184 = vector.extract_strided_slice %182 {offsets = [1, 0], sizes = [1, 128], strides = [1, 1]} : vector<2x128xf32> to vector<1x128xf32>
    %185 = arith.mulf %183, %183 : vector<1x128xf32>
    %186 = arith.subf %184, %185 : vector<1x128xf32>
    %cst_71 = arith.constant 0.000000e+00 : f32
    %187 = vector.broadcast %cst_71 : f32 to vector<1x128xf32>
    %188 = arith.maximumf %186, %187 : vector<1x128xf32>
    %c0_72 = arith.constant 0 : index
    %c0_73 = arith.constant 0 : index
    %189 = vector.load %arg16[%c0_72, %c0_73] : memref<1x128xf32, #tpu.memory_space<vmem>>, vector<1x128xf32>
    %cst_74 = arith.constant 9.99999974E-6 : f32
    %190 = vector.broadcast %cst_74 : f32 to vector<1x128xf32>
    %191 = arith.addf %188, %190 : vector<1x128xf32>
    %192 = math.rsqrt %191 : vector<1x128xf32>
    %193 = arith.mulf %189, %192 : vector<1x128xf32>
    %c0_75 = arith.constant 0 : index
    %c0_76 = arith.constant 0 : index
    %194 = vector.load %arg17[%c0_75, %c0_76] : memref<1x128xf32, #tpu.memory_space<vmem>>, vector<1x128xf32>
    %195 = arith.mulf %183, %193 : vector<1x128xf32>
    %196 = arith.subf %194, %195 : vector<1x128xf32>
    %197 = vector.broadcast %193 : vector<1x128xf32> to vector<32x128xf32>
    %198 = arith.mulf %174, %197 : vector<32x128xf32>
    %199 = vector.broadcast %196 : vector<1x128xf32> to vector<32x128xf32>
    %200 = arith.addf %198, %199 : vector<32x128xf32>
    %cst_77 = arith.constant 0.000000e+00 : f32
    %201 = vector.broadcast %cst_77 : f32 to vector<32x128xf32>
    %202 = arith.maximumf %200, %201 : vector<32x128xf32>
    %c0_78 = arith.constant 0 : index
    %c0_79 = arith.constant 0 : index
    %203 = vector.load %arg18[%c0_78, %c0_79] : memref<32x128xf32, #tpu.memory_space<vmem>>, vector<32x128xf32>
    tpu.vector_store %arg18[%c0_78, %c0_79], %202 {strides = array<i32>} : memref<32x128xf32, #tpu.memory_space<vmem>>, vector<32x128xf32>,
    return
  }
  func.func @transform_0(%arg0: i32) -> (i32, i32) {
    %c0_i32 = arith.constant 0 : i32
    %c0_i32_0 = arith.constant 0 : i32
    %c0_i32_1 = arith.constant 0 : i32
    return %c0_i32, %c0_i32_0 : i32, i32
  }
  func.func @transform_1(%arg0: i32) -> (i32, i32) {
    %c0_i32 = arith.constant 0 : i32
    %c0_i32_0 = arith.constant 0 : i32
    %c0_i32_1 = arith.constant 0 : i32
    return %c0_i32, %c0_i32_0 : i32, i32
  }
  func.func @transform_2(%arg0: i32) -> (i32, i32) {
    %c0_i32 = arith.constant 0 : i32
    %c0_i32_0 = arith.constant 0 : i32
    %c0_i32_1 = arith.constant 0 : i32
    return %c0_i32, %c0_i32_0 : i32, i32
  }
  func.func @transform_3(%arg0: i32) -> (i32, i32) {
    %c0_i32 = arith.constant 0 : i32
    %c0_i32_0 = arith.constant 0 : i32
    %c0_i32_1 = arith.constant 0 : i32
    return %c0_i32, %c0_i32_0 : i32, i32
  }
  func.func @transform_4(%arg0: i32) -> (i32, i32) {
    %c0_i32 = arith.constant 0 : i32
    %c0_i32_0 = arith.constant 0 : i32
    %c0_i32_1 = arith.constant 0 : i32
    return %c0_i32, %c0_i32_0 : i32, i32
  }
  func.func @transform_5(%arg0: i32) -> (i32, i32) {
    %c0_i32 = arith.constant 0 : i32
    %c0_i32_0 = arith.constant 0 : i32
    %c0_i32_1 = arith.constant 0 : i32
    return %c0_i32, %c0_i32_0 : i32, i32
  }
  func.func @transform_6(%arg0: i32) -> (i32, i32) {
    %c0_i32 = arith.constant 0 : i32
    %c0_i32_0 = arith.constant 0 : i32
    %c0_i32_1 = arith.constant 0 : i32
    return %c0_i32, %c0_i32_0 : i32, i32
  }
  func.func @transform_7(%arg0: i32) -> (i32, i32) {
    %c0_i32 = arith.constant 0 : i32
    %c0_i32_0 = arith.constant 0 : i32
    %c0_i32_1 = arith.constant 0 : i32
    return %c0_i32, %c0_i32_0 : i32, i32
  }
  func.func @transform_8(%arg0: i32) -> (i32, i32) {
    %c0_i32 = arith.constant 0 : i32
    %c0_i32_0 = arith.constant 0 : i32
    %c0_i32_1 = arith.constant 0 : i32
    return %c0_i32, %c0_i32_0 : i32, i32
  }
  func.func @transform_9(%arg0: i32) -> (i32, i32) {
    %c0_i32 = arith.constant 0 : i32
    %c0_i32_0 = arith.constant 0 : i32
    %c0_i32_1 = arith.constant 0 : i32
    return %c0_i32, %c0_i32_0 : i32, i32
  }
  func.func @transform_10(%arg0: i32) -> (i32, i32) {
    %c0_i32 = arith.constant 0 : i32
    %c0_i32_0 = arith.constant 0 : i32
    %c0_i32_1 = arith.constant 0 : i32
    return %c0_i32, %c0_i32_0 : i32, i32
  }
  func.func @transform_11(%arg0: i32) -> (i32, i32) {
    %c0_i32 = arith.constant 0 : i32
    %c0_i32_0 = arith.constant 0 : i32
    %c0_i32_1 = arith.constant 0 : i32
    return %c0_i32, %c0_i32_0 : i32, i32
  }
  func.func @transform_12(%arg0: i32) -> (i32, i32) {
    %c0_i32 = arith.constant 0 : i32
    %c0_i32_0 = arith.constant 0 : i32
    %c0_i32_1 = arith.constant 0 : i32
    return %c0_i32, %c0_i32_0 : i32, i32
  }
  func.func @transform_13(%arg0: i32) -> (i32, i32) {
    %c0_i32 = arith.constant 0 : i32
    %c0_i32_0 = arith.constant 0 : i32
    %c0_i32_1 = arith.constant 0 : i32
    return %c0_i32, %c0_i32_0 : i32, i32
  }
  func.func @transform_14(%arg0: i32) -> (i32, i32) {
    %c0_i32 = arith.constant 0 : i32
    %c0_i32_0 = arith.constant 0 : i32
    %c0_i32_1 = arith.constant 0 : i32
    return %c0_i32, %c0_i32_0 : i32, i32
  }
  func.func @transform_15(%arg0: i32) -> (i32, i32) {
    %c0_i32 = arith.constant 0 : i32
    %c0_i32_0 = arith.constant 0 : i32
    %c0_i32_1 = arith.constant 0 : i32
    return %c0_i32, %c0_i32_0 : i32, i32
  }
  func.func @transform_16(%arg0: i32) -> (i32, i32) {
    %c0_i32 = arith.constant 0 : i32
    %c0_i32_0 = arith.constant 0 : i32
    %c0_i32_1 = arith.constant 0 : i32
    return %c0_i32, %c0_i32_0 : i32, i32
  }
  func.func @transform_17(%arg0: i32) -> (i32, i32) {
    %c0_i32 = arith.constant 0 : i32
    %c0_i32_0 = arith.constant 0 : i32
    %c0_i32_1 = arith.constant 0 : i32
    return %c0_i32, %c0_i32_0 : i32, i32
  }
}

</mosaic_0001>

<bundles_post_ra>
// kernel: tile.73
= control target key start
LH: loop header
LB: loop body
LE: loop exit
PB: predicated region body
PF: predicated region fallthrough
CT: control target
= control target key end

     0   :  { %s28_s0 = inlined_call_operand.vmem [shape: f32[4], index: 0, kind: input, shape index: {}]   ;;  %s29_s1 = inlined_call_operand.vmem [shape: f32[16,4], index: 1, kind: output, shape index: {}]  }
   0x1   :  { %v4_v0 = vld [vmem:[%s28_s0] ss:$0 sm:$0xff] }
   0x2   :  { %5 = vst [vmem:[%s29_s1] sm:$0xff] %v4_v0  ;;  %8 = vst [vmem:[%s29_s1 + $0x8] sm:$0xff] %v4_v0 }

// kernel: tile.74
= control target key start
LH: loop header
LB: loop body
LE: loop exit
PB: predicated region body
PF: predicated region fallthrough
CT: control target
= control target key end

     0   :  { %s131_s10 = smov 60   ;;  %s132_s11 = smov 52   ;;  %vm3_vm0 = vcmask 31744   ;;  %vm9_vm1 = vcmask 523744   ;;  %vm15_vm2 = vcmask 490944   ;;  %vm21_vm3 = vcmask 458144   ;;  %s207_s0 = inlined_call_operand.vmem [shape: f32[16,4], index: 0, kind: input, shape index: {}]   ;;  %s208_s1 = inlined_call_operand.vmem [shape: f32[64], index: 1, kind: output, shape index: {}]  }
   0x1   :  { %v101_v0 = vld [vmem:[%s207_s0 + $0xf] sm:$0x1]   ;;  %v103_v1 = vld [vmem:[%s207_s0 + $0xd] sm:$0x1]   ;;  %v102_v2 = vld [vmem:[%s207_s0 + $0xe] sm:$0x1]  }
   0x2   :  { %7 = vrot.lane.b32.xlu0 %v101_v0, %s131_s10  ;;  %19 = vrot.lane.b32.xlu1 %v103_v1, %s132_s11  ;;  %v104_v3 = vld [vmem:[%s207_s0 + $0xc] sm:$0x1]   ;;  %s133_s16 = smov 56   ;;  %s134_s17 = smov 48   ;;  %v105_v4 = vld [vmem:[%s207_s0 + $0xb] sm:$0x1]  }
   0x3   :  { %v106_v5 = vld [vmem:[%s207_s0 + $0xa] sm:$0x1]   ;;  %v2_v6 = vld [vmem:[%s207_s0] sm:$0x1]   ;;  %s135_s24 = smov 44   ;;  %s136_s25 = smov 40  }
   0x4   :  { %4 = vst.msk [vmem:[#allocation0] sm:$0x1] %vm3_vm0, %v2_v6   ;;  %v107_v7 = vld [vmem:[%s207_s0 + $0x9] sm:$0x1]   ;;  %v108_v8 = vld [vmem:[%s207_s0 + $0x8] sm:$0x1]  }
   0x5   :  { %s137_s30 = smov 36   ;;  %s138_s2 = smov 32   ;;  %v109_v9 = vld [vmem:[%s207_s0 + $0x7] sm:$0x1]   ;;  %v110_v10 = vld [vmem:[%s207_s0 + $0x6] sm:$0x1]  }
   0x6   :  { %13 = vrot.lane.b32.xlu0 %v102_v2, %s133_s16  ;;  %25 = vrot.lane.b32.xlu1 %v104_v3, %s134_s17  ;;  %s139_s7 = smov 28   ;;  %s140_s8 = smov 24   ;;  %v111_v11 = vld [vmem:[%s207_s0 + $0x5] sm:$0x1]   ;;  %v112_v12 = vld [vmem:[%s207_s0 + $0x4] sm:$0x1]  }
   0x7   :  { %s141_s13 = smov 20   ;;  %s142_s14 = smov 16   ;;  %v113_v13 = vld [vmem:[%s207_s0 + $0x3] sm:$0x1]   ;;  %v114_v14 = vld [vmem:[%s207_s0 + $0x2] sm:$0x1]  }
   0x8   :  { %s143_s19 = smov 12   ;;  %s144_s20 = smov 8   ;;  %v115_v15 = vld [vmem:[%s207_s0 + $0x1] sm:$0x1]   ;;  %vm27_vm4 = vcmask 425344   ;;  %vm33_vm5 = vcmask 392544  }
   0x9   :  { %s145_s0 = smov 4   ;;  %vm39_vm6 = vcmask 359744   ;;  %vm45_vm7 = vcmask 326944   ;;  %vm51_vm8 = vcmask 294144   ;;  %vm57_vm9 = vcmask 261344  }
   0xa   :  { %31 = vrot.lane.b32.xlu0 %v105_v4, %s135_s24  ;;  %37 = vrot.lane.b32.xlu1 %v106_v5, %s136_s25  ;;  %vm63_vm10 = vcmask 228544   ;;  %vm69_vm11 = vcmask 195744   ;;  %vm75_vm12 = vcmask 162944   ;;  %vm81_vm13 = vcmask 130144  }
   0xb   :  { %vm87_vm14 = vcmask 97344   ;;  %vm93_vm15 = vcmask 64544  }
   0xe   :  { %43 = vrot.lane.b32.xlu0 %v107_v7, %s137_s30  ;;  %49 = vrot.lane.b32.xlu1 %v108_v8, %s138_s2 }
  0x12   :  { %55 = vrot.lane.b32.xlu0 %v109_v9, %s139_s7  ;;  %61 = vrot.lane.b32.xlu1 %v110_v10, %s140_s8 }
  0x16   :  { %67 = vrot.lane.b32.xlu0 %v111_v11, %s141_s13  ;;  %73 = vrot.lane.b32.xlu1 %v112_v12, %s142_s14 }
  0x1a   :  { %79 = vrot.lane.b32.xlu0 %v113_v13, %s143_s19  ;;  %85 = vrot.lane.b32.xlu1 %v114_v14, %s144_s20 }
  0x1e   :  { %91 = vrot.lane.b32.xlu0 %v115_v15, %s145_s0 }
  0x74   :  { %v8_v16 = vpop.permute.xlu0 %7   ;;  %v20_v17 = vpop.permute.xlu1 %19  }
  0x75   :  { %10 = vst.msk [vmem:[#allocation0] sm:$0x1] %vm9_vm1, %v8_v16  }
  0x78   :  { %v14_v18 = vpop.permute.xlu0 %13   ;;  %v26_v19 = vpop.permute.xlu1 %25  }
  0x79   :  { %16 = vst.msk [vmem:[#allocation0] sm:$0x1] %vm15_vm2, %v14_v18  }
  0x7a   :  { %22 = vst.msk [vmem:[#allocation0] sm:$0x1] %vm21_vm3, %v20_v17  }
  0x7b   :  { %28 = vst.msk [vmem:[#allocation0] sm:$0x1] %vm27_vm4, %v26_v19  }
  0x7c   :  { %v32_v20 = vpop.permute.xlu0 %31   ;;  %v38_v21 = vpop.permute.xlu1 %37  }
  0x7d   :  { %34 = vst.msk [vmem:[#allocation0] sm:$0x1] %vm33_vm5, %v32_v20  }
  0x7e   :  { %40 = vst.msk [vmem:[#allocation0] sm:$0x1] %vm39_vm6, %v38_v21  }
  0x80   :  { %v44_v22 = vpop.permute.xlu0 %43   ;;  %v50_v23 = vpop.permute.xlu1 %49  }
  0x81   :  { %46 = vst.msk [vmem:[#allocation0] sm:$0x1] %vm45_vm7, %v44_v22  }
  0x82   :  { %52 = vst.msk [vmem:[#allocation0] sm:$0x1] %vm51_vm8, %v50_v23  }
  0x84   :  { %v56_v24 = vpop.permute.xlu0 %55   ;;  %v62_v25 = vpop.permute.xlu1 %61  }
  0x85   :  { %58 = vst.msk [vmem:[#allocation0] sm:$0x1] %vm57_vm9, %v56_v24  }
  0x86   :  { %64 = vst.msk [vmem:[#allocation0] sm:$0x1] %vm63_vm10, %v62_v25  }
  0x88   :  { %v68_v26 = vpop.permute.xlu0 %67   ;;  %v74_v27 = vpop.permute.xlu1 %73  }
  0x89   :  { %70 = vst.msk [vmem:[#allocation0] sm:$0x1] %vm69_vm11, %v68_v26  }
  0x8a   :  { %76 = vst.msk [vmem:[#allocation0] sm:$0x1] %vm75_vm12, %v74_v27  }
  0x8c   :  { %v80_v28 = vpop.permute.xlu0 %79   ;;  %v86_v29 = vpop.permute.xlu1 %85  }
  0x8d   :  { %82 = vst.msk [vmem:[#allocation0] sm:$0x1] %vm81_vm13, %v80_v28  }
  0x8e   :  { %88 = vst.msk [vmem:[#allocation0] sm:$0x1] %vm87_vm14, %v86_v29  }
  0x90   :  { %v92_v30 = vpop.permute.xlu0 %91  }
  0x91   :  { %94 = vst.msk [vmem:[#allocation0] sm:$0x1] %vm93_vm15, %v92_v30  }
  0x98   :  { %v98_v31 = vld [vmem:[#allocation0] sm:$0x1] }
  0x99   :  { %100 = vst [vmem:[%s208_s1] sm:$0x1] %v98_v31 }

// kernel: tile.63
= control target key start
LH: loop header
LB: loop body
LE: loop exit
PB: predicated region body
PF: predicated region fallthrough
CT: control target
= control target key end

     0   :  { %s28_s0 = inlined_call_operand.vmem [shape: f32[8], index: 0, kind: input, shape index: {}]   ;;  %s29_s1 = inlined_call_operand.vmem [shape: f32[14,8], index: 1, kind: output, shape index: {}]  }
   0x1   :  { %v4_v0 = vld [vmem:[%s28_s0] ss:$0 sm:$0xff] }
   0x2   :  { %5 = vst [vmem:[%s29_s1] sm:$0xff] %v4_v0  ;;  %8 = vst [vmem:[%s29_s1 + $0x8] sm:$0xff] %v4_v0 }

// kernel: tile.64
= control target key start
LH: loop header
LB: loop body
LE: loop exit
PB: predicated region body
PF: predicated region fallthrough
CT: control target
= control target key end

     0   :  { %s115_s10 = smov 104   ;;  %s116_s11 = smov 88   ;;  %vm3_vm0 = vcmask 64512   ;;  %vm9_vm1 = vcmask 917312   ;;  %vm15_vm2 = vcmask 851712   ;;  %vm21_vm3 = vcmask 786112   ;;  %s183_s0 = inlined_call_operand.vmem [shape: f32[14,8], index: 0, kind: input, shape index: {}]   ;;  %s184_s1 = inlined_call_operand.vmem [shape: f32[112], index: 1, kind: output, shape index: {}]  }
   0x1   :  { %v89_v0 = vld [vmem:[%s183_s0 + $0xd] sm:$0x1]   ;;  %v91_v1 = vld [vmem:[%s183_s0 + $0xb] sm:$0x1]   ;;  %v90_v2 = vld [vmem:[%s183_s0 + $0xc] sm:$0x1]  }
   0x2   :  { %7 = vrot.lane.b32.xlu0 %v89_v0, %s115_s10  ;;  %19 = vrot.lane.b32.xlu1 %v91_v1, %s116_s11  ;;  %v92_v3 = vld [vmem:[%s183_s0 + $0xa] sm:$0x1]   ;;  %s117_s16 = smov 96   ;;  %s118_s17 = smov 80   ;;  %v93_v4 = vld [vmem:[%s183_s0 + $0x9] sm:$0x1]  }
   0x3   :  { %v94_v5 = vld [vmem:[%s183_s0 + $0x8] sm:$0x1]   ;;  %v2_v6 = vld [vmem:[%s183_s0] sm:$0x1]   ;;  %s119_s24 = smov 72   ;;  %s120_s25 = smov 64  }
   0x4   :  { %4 = vst.msk [vmem:[#allocation0] sm:$0x1] %vm3_vm0, %v2_v6   ;;  %v95_v7 = vld [vmem:[%s183_s0 + $0x7] sm:$0x1]   ;;  %v96_v8 = vld [vmem:[%s183_s0 + $0x6] sm:$0x1]  }
   0x5   :  { %s121_s30 = smov 56   ;;  %s122_s2 = smov 48   ;;  %v97_v9 = vld [vmem:[%s183_s0 + $0x5] sm:$0x1]   ;;  %v98_v10 = vld [vmem:[%s183_s0 + $0x4] sm:$0x1]  }
   0x6   :  { %13 = vrot.lane.b32.xlu0 %v90_v2, %s117_s16  ;;  %25 = vrot.lane.b32.xlu1 %v92_v3, %s118_s17  ;;  %s123_s7 = smov 40   ;;  %s124_s8 = smov 32   ;;  %v99_v11 = vld [vmem:[%s183_s0 + $0x3] sm:$0x1]   ;;  %v100_v12 = vld [vmem:[%s183_s0 + $0x2] sm:$0x1]  }
   0x7   :  { %s125_s13 = smov 24   ;;  %s126_s14 = smov 16   ;;  %v101_v13 = vld [vmem:[%s183_s0 + $0x1] sm:$0x1]   ;;  %vm27_vm4 = vcmask 720512   ;;  %vm33_vm5 = vcmask 654912  }
   0x8   :  { %s127_s0 = smov 8   ;;  %vm39_vm6 = vcmask 589312   ;;  %vm45_vm7 = vcmask 523712   ;;  %vm51_vm8 = vcmask 458112   ;;  %vm57_vm9 = vcmask 392512  }
   0x9   :  { %vm63_vm10 = vcmask 326912   ;;  %vm69_vm11 = vcmask 261312   ;;  %vm75_vm12 = vcmask 195712   ;;  %vm81_vm13 = vcmask 130112  }
   0xa   :  { %31 = vrot.lane.b32.xlu0 %v93_v4, %s119_s24  ;;  %37 = vrot.lane.b32.xlu1 %v94_v5, %s120_s25 }
   0xe   :  { %43 = vrot.lane.b32.xlu0 %v95_v7, %s121_s30  ;;  %49 = vrot.lane.b32.xlu1 %v96_v8, %s122_s2 }
  0x12   :  { %55 = vrot.lane.b32.xlu0 %v97_v9, %s123_s7  ;;  %61 = vrot.lane.b32.xlu1 %v98_v10, %s124_s8 }
  0x16   :  { %67 = vrot.lane.b32.xlu0 %v99_v11, %s125_s13  ;;  %73 = vrot.lane.b32.xlu1 %v100_v12, %s126_s14 }
  0x1a   :  { %79 = vrot.lane.b32.xlu0 %v101_v13, %s127_s0 }
  0x74   :  { %v8_v14 = vpop.permute.xlu0 %7   ;;  %v20_v15 = vpop.permute.xlu1 %19  }
  0x75   :  { %10 = vst.msk [vmem:[#allocation0] sm:$0x1] %vm9_vm1, %v8_v14  }
  0x78   :  { %v14_v16 = vpop.permute.xlu0 %13   ;;  %v26_v17 = vpop.permute.xlu1 %25  }
  0x79   :  { %16 = vst.msk [vmem:[#allocation0] sm:$0x1] %vm15_vm2, %v14_v16  }
  0x7a   :  { %22 = vst.msk [vmem:[#allocation0] sm:$0x1] %vm21_vm3, %v20_v15  }
  0x7b   :  { %28 = vst.msk [vmem:[#allocation0] sm:$0x1] %vm27_vm4, %v26_v17  }
  0x7c   :  { %v32_v18 = vpop.permute.xlu0 %31   ;;  %v38_v19 = vpop.permute.xlu1 %37  }
  0x7d   :  { %34 = vst.msk [vmem:[#allocation0] sm:$0x1] %vm33_vm5, %v32_v18  }
  0x7e   :  { %40 = vst.msk [vmem:[#allocation0] sm:$0x1] %vm39_vm6, %v38_v19  }
  0x80   :  { %v44_v20 = vpop.permute.xlu0 %43   ;;  %v50_v21 = vpop.permute.xlu1 %49  }
  0x81   :  { %46 = vst.msk [vmem:[#allocation0] sm:$0x1] %vm45_vm7, %v44_v20  }
  0x82   :  { %52 = vst.msk [vmem:[#allocation0] sm:$0x1] %vm51_vm8, %v50_v21  }
  0x84   :  { %v56_v22 = vpop.permute.xlu0 %55   ;;  %v62_v23 = vpop.permute.xlu1 %61  }
  0x85   :  { %58 = vst.msk [vmem:[#allocation0] sm:$0x1] %vm57_vm9, %v56_v22  }
  0x86   :  { %64 = vst.msk [vmem:[#allocation0] sm:$0x1] %vm63_vm10, %v62_v23  }
  0x88   :  { %v68_v24 = vpop.permute.xlu0 %67   ;;  %v74_v25 = vpop.permute.xlu1 %73  }
  0x89   :  { %70 = vst.msk [vmem:[#allocation0] sm:$0x1] %vm69_vm11, %v68_v24  }
  0x8a   :  { %76 = vst.msk [vmem:[#allocation0] sm:$0x1] %vm75_vm12, %v74_v25  }
  0x8c   :  { %v80_v26 = vpop.permute.xlu0 %79  }
  0x8d   :  { %82 = vst.msk [vmem:[#allocation0] sm:$0x1] %vm81_vm13, %v80_v26  }
  0x94   :  { %v86_v27 = vld [vmem:[#allocation0] sm:$0x1] }
  0x95   :  { %88 = vst [vmem:[%s184_s1] sm:$0x1] %v86_v27 }

// kernel: tile.53
= control target key start
LH: loop header
LB: loop body
LE: loop exit
PB: predicated region body
PF: predicated region fallthrough
CT: control target
= control target key end

     0   :  { %s28_s0 = inlined_call_operand.vmem [shape: f32[16], index: 0, kind: input, shape index: {}]   ;;  %s29_s1 = inlined_call_operand.vmem [shape: f32[12,16], index: 1, kind: output, shape index: {}]  }
   0x1   :  { %v4_v0 = vld [vmem:[%s28_s0] ss:$0 sm:$0xff] }
   0x2   :  { %5 = vst [vmem:[%s29_s1] sm:$0xff] %v4_v0  ;;  %8 = vst [vmem:[%s29_s1 + $0x8] sm:$0xff] %v4_v0 }

// kernel: tile.54
= control target key start
LH: loop header
LB: loop body
LE: loop exit
PB: predicated region body
PF: predicated region fallthrough
CT: control target
= control target key end

     0   :  { %s71_s10 = smov 112   ;;  %s72_s11 = smov 80   ;;  %vm4_vm0 = vcmask 130048   ;;  %vm10_vm1 = vcmask 1048448   ;;  %vm16_vm2 = vcmask 917248   ;;  %vm22_vm3 = vcmask 786048   ;;  %s115_s0 = inlined_call_operand.vmem [shape: f32[12,16], index: 0, kind: input, shape index: {}]   ;;  %s116_s1 = inlined_call_operand.vmem [shape: f32[192], index: 1, kind: output, shape index: {}]  }
   0x1   :  { %v57_v0 = vld [vmem:[%s115_s0 + $0x7] sm:$0x1]   ;;  %v59_v1 = vld [vmem:[%s115_s0 + $0x5] sm:$0x1]   ;;  %v58_v2 = vld [vmem:[%s115_s0 + $0x6] sm:$0x1]  }
   0x2   :  { %8 = vrot.lane.b32.xlu0 %v57_v0, %s71_s10  ;;  %20 = vrot.lane.b32.xlu1 %v59_v1, %s72_s11  ;;  %v60_v3 = vld [vmem:[%s115_s0 + $0x4] sm:$0x1]   ;;  %s31_s16 = smov 3  ;;  %s38_s17 = smov 3  ;;  %vm28_vm4 = vcmask 654848   ;;  %vm35_vm5 = vcmask 523648  }
   0x3   :  { %s73_s18 = smov 96   ;;  %s74_s19 = smov 64   ;;  %v61_v4 = vld [vmem:[%s115_s0 + $0x3] ss:$8 sm:%s31_s16]   ;;  %v62_v5 = vld [vmem:[%s115_s0 + $0x2] ss:$8 sm:%s38_s17]  }
   0x4   :  { %s2_s22 = smov 3  ;;  %s45_s27 = smov 3  ;;  %vm42_vm6 = vcmask 392448   ;;  %vm49_vm7 = vcmask 261248  }
   0x5   :  { %v3_v6 = vld [vmem:[%s115_s0] ss:$8 sm:%s2_s22]   ;;  %s75_s28 = smov 48   ;;  %s76_s29 = smov 32   ;;  %v63_v7 = vld [vmem:[%s115_s0 + $0x1] ss:$8 sm:%s45_s27]  }
   0x6   :  { %14 = vrot.lane.b32.xlu0 %v58_v2, %s73_s18  ;;  %26 = vrot.lane.b32.xlu1 %v60_v3, %s74_s19  ;;  %5 = vst.msk [vmem:[#allocation0] sm:$0x3] %vm4_vm0, %v3_v6   ;;  %s77_s0 = smov 16  }
   0xa   :  { %33 = vrot.lane.b32.xlu0 %v61_v4, %s75_s28  ;;  %40 = vrot.lane.b32.xlu1 %v62_v5, %s76_s29 }
   0xe   :  { %47 = vrot.lane.b32.xlu0 %v63_v7, %s77_s0 }
  0x74   :  { %v9_v8 = vpop.permute.xlu0 %8   ;;  %v21_v9 = vpop.permute.xlu1 %20  }
  0x75   :  { %11 = vst.msk [vmem:[#allocation0] sm:$0x1] %vm10_vm1, %v9_v8  }
  0x78   :  { %v15_v10 = vpop.permute.xlu0 %14   ;;  %v27_v11 = vpop.permute.xlu1 %26  }
  0x79   :  { %17 = vst.msk [vmem:[#allocation0] sm:$0x1] %vm16_vm2, %v15_v10  }
  0x7a   :  { %23 = vst.msk [vmem:[#allocation0] sm:$0x1] %vm22_vm3, %v21_v9  }
  0x7b   :  { %29 = vst.msk [vmem:[#allocation0] sm:$0x1] %vm28_vm4, %v27_v11  }
  0x7c   :  { %v34_v12 = vpop.permute.xlu0 %33   ;;  %v41_v13 = vpop.permute.xlu1 %40  }
  0x7d   :  { %36 = vst.msk [vmem:[#allocation0] sm:$0x3] %vm35_vm5, %v34_v12  }
  0x7e   :  { %43 = vst.msk [vmem:[#allocation0] sm:$0x3] %vm42_vm6, %v41_v13  }
  0x80   :  { %v48_v14 = vpop.permute.xlu0 %47  }
  0x81   :  { %50 = vst.msk [vmem:[#allocation0] sm:$0x3] %vm49_vm7, %v48_v14  }
  0x88   :  { %v54_v15 = vld [vmem:[#allocation0] sm:$0x3] }
  0x89   :  { %56 = vst [vmem:[%s116_s1] sm:$0x3] %v54_v15 }

// kernel: autoencoder_forward.1
= control target key start
LH: loop header
LB: loop body
LE: loop exit
PB: predicated region body
PF: predicated region fallthrough
CT: control target
= control target key end

     0   :  { %v3267_v1 = vmov 0   ;;  %v3268_v34 = vmov 0.0|0.0   ;;  %vm3269_vm0 = vmmov 0   ;;  %v3270_v52 = vmov 0.0   ;;  %s4403_s1 = inlined_call_operand.vmem [shape: bf16[128,384], index: 1, kind: input, shape index: {}]   ;;  %s4404_s0 = inlined_call_operand.vmem [shape: f32[32,128], index: 0, kind: input, shape index: {}]   ;;  %s4405_s2 = inlined_call_operand.vmem [shape: f32[128,128], index: 2, kind: input, shape index: {}, may-alias: {2,10}]   ;;  %s4406_s5 = inlined_call_operand.vmem [shape: bf16[128,768], index: 5, kind: input, shape index: {}]   ;;  %s4407_s3 = inlined_call_operand.vmem [shape: f32[1,128], index: 3, kind: input, shape index: {}]   ;;  %s4408_s4 = inlined_call_operand.vmem [shape: f32[1,128], index: 4, kind: input, shape index: {}]   ;;  %s4409_s6 = inlined_call_operand.vmem [shape: f32[256,256], index: 6, kind: input, shape index: {}]   ;;  %s4410_s9 = inlined_call_operand.vmem [shape: bf16[256,384], index: 9, kind: input, shape index: {}]   ;;  %s4411_s7 = inlined_call_operand.vmem [shape: f32[1,256], index: 7, kind: input, shape index: {}]   ;;  %s4412_s8 = inlined_call_operand.vmem [shape: f32[1,256], index: 8, kind: input, shape index: {}]   ;;  %s4413_s10 = inlined_call_operand.vmem [shape: f32[128,128], index: 10, kind: input, shape index: {}, may-alias: {2,10}]   ;;  %s4414_s13 = inlined_call_operand.vmem [shape: bf16[128,384], index: 13, kind: input, shape index: {}]   ;;  %s4415_s11 = inlined_call_operand.vmem [shape: f32[1,128], index: 11, kind: input, shape index: {}]   ;;  %s4416_s12 = inlined_call_operand.vmem [shape: f32[1,128], index: 12, kind: input, shape index: {}]   ;;  %s4417_s14 = inlined_call_operand.vmem [shape: f32[128,128], index: 14, kind: input, shape index: {}]   ;;  %s4418_s15 = inlined_call_operand.vmem [shape: f32[1,128], index: 15, kind: input, shape index: {}]   ;;  %s4419_s16 = inlined_call_operand.vmem [shape: f32[1,128], index: 16, kind: input, shape index: {}]   ;;  %s4420_s17 = inlined_call_operand.vmem [shape: f32[32,128], index: 17, kind: output, shape index: {}]  }
   0x1   :  { %4423 = sst [smem:[#allocation2_spill]] %s4403_s1  ;;  %255 = vmatprep.mubr.bf16.mxu0 %v3267_v1  ;;  %v399_v31 = vld [vmem:[%s4405_s2] sm:$0xff]  ;;  %v400_v32 = vld [vmem:[%s4405_s2 + $0x8] sm:$0xff]  ;;  %v401_v35 = vld [vmem:[%s4405_s2 + $0x10] sm:$0xff]  ;;  %vm327_vm1 = vcmask 1046528   ;;  %vm337_vm2 = vcmask 1045504  }
   0x2   :  { %4424 = sst [smem:[#allocation3_spill]] %s4404_s0  ;;  %s4425_s26 = sld [smem:[#allocation2_spill]]  ;;  %v2917_v33 = vpack.c.bf16 %v400_v32, %v399_v31  ;;  %v402_v36 = vld [vmem:[%s4405_s2 + $0x18] sm:$0xff]  ;;  %v403_v38 = vld [vmem:[%s4405_s2 + $0x20] sm:$0xff]  ;;  %v404_v39 = vld [vmem:[%s4405_s2 + $0x28] sm:$0xff]  ;;  %vm374_vm3 = vcmask 1043456  }
   0x3   :  { %s4426_s19 = sld [smem:[#allocation3_spill]]  ;;  %v2920_v37 = vpack.c.bf16 %v402_v36, %v401_v35  ;;  %v2923_v40 = vpack.c.bf16 %v404_v39, %v403_v38  ;;  %v405_v41 = vld [vmem:[%s4405_s2 + $0x30] sm:$0xff]  ;;  %v406_v42 = vld [vmem:[%s4405_s2 + $0x38] sm:$0xff]  ;;  %v407_v44 = vld [vmem:[%s4405_s2 + $0x40] sm:$0xff]  ;;  %vm397_vm4 = vcmask 1040384   ;;  %vm1824_vm15 = vcmask 1041408  }
   0x4   :  { %v2926_v43 = vpack.c.bf16 %v406_v42, %v405_v41  ;;  %v408_v45 = vld [vmem:[%s4405_s2 + $0x48] sm:$0xff]  ;;  %v409_v47 = vld [vmem:[%s4405_s2 + $0x50] sm:$0xff]  ;;  %v410_v48 = vld [vmem:[%s4405_s2 + $0x58] sm:$0xff] }
   0x5   :  { %v2929_v46 = vpack.c.bf16 %v408_v45, %v407_v44  ;;  %v2932_v49 = vpack.c.bf16 %v410_v48, %v409_v47  ;;  %v411_v50 = vld [vmem:[%s4405_s2 + $0x60] sm:$0xff]  ;;  %v412_v51 = vld [vmem:[%s4405_s2 + $0x68] sm:$0xff]  ;;  %v413_v54 = vld [vmem:[%s4405_s2 + $0x70] sm:$0xff] }
   0x6   :  { %v2935_v53 = vpack.c.bf16 %v412_v51, %v411_v50  ;;  %v414_v55 = vld [vmem:[%s4405_s2 + $0x78] sm:$0xff] }
   0x7   :  { %v2938_v56 = vpack.c.bf16 %v414_v55, %v413_v54 }
   0x8   :  { %v3057_v0 = vld [vmem:[%s4425_s26 + $0x4] ss:$12 sps:$4 sm:$0xff]   ;;  %v3059_v2 = vld [vmem:[%s4425_s26] ss:$12 sps:$4 sm:$0xff]   ;;  %v3060_v3 = vld [vmem:[%s4425_s26 + $0x8] ss:$12 sps:$4 sm:$0xff]  }
   0x9   :  { %223 = vmatprep.subr.bf16.mxu0 %v3057_v0  ;;  %v3061_v4 = vld [vmem:[%s4425_s26 + $0x1c] ss:$12 sps:$4 sm:$0xff]   ;;  %v3063_v5 = vld [vmem:[%s4425_s26 + $0x18] ss:$12 sps:$4 sm:$0xff]   ;;  %2771 = vmatprep.subr.bf16.mxu1 %v3060_v3  ;;  %v3064_v6 = vld [vmem:[%s4425_s26 + $0x20] ss:$12 sps:$4 sm:$0xff]  }
   0xa   :  { %224 = vmatpush1.bf16.msra.mxu0 %v3059_v2  ;;  %2772 = vmatpush3.bf16.msra.mxu1 %v3060_v3  ;;  %v3065_v7 = vld [vmem:[%s4425_s26 + $0x34] ss:$12 sps:$4 sm:$0xff]   ;;  %v3068_v8 = vld [vmem:[%s4425_s26 + $0x38] ss:$12 sps:$4 sm:$0xff]   ;;  %v3067_v9 = vld [vmem:[%s4425_s26 + $0x30] ss:$12 sps:$4 sm:$0xff]  }
   0xb   :  { %225 = vmatprep.subr.bf16.mxu0 %v3061_v4  ;;  %2773 = vmatprep.subr.bf16.mxu1 %v3064_v6  ;;  %v3069_v10 = vld [vmem:[%s4425_s26 + $0x4c] ss:$12 sps:$4 sm:$0xff]   ;;  %v3072_v11 = vld [vmem:[%s4425_s26 + $0x50] ss:$12 sps:$4 sm:$0xff]   ;;  %v3071_v12 = vld [vmem:[%s4425_s26 + $0x48] ss:$12 sps:$4 sm:$0xff]  }
   0xc   :  { %v3073_v13 = vld [vmem:[%s4425_s26 + $0x64] ss:$12 sps:$4 sm:$0xff]   ;;  %v3076_v14 = vld [vmem:[%s4425_s26 + $0x68] ss:$12 sps:$4 sm:$0xff]   ;;  %v3075_v15 = vld [vmem:[%s4425_s26 + $0x60] ss:$12 sps:$4 sm:$0xff]  }
   0xd   :  { %v3077_v16 = vld [vmem:[%s4425_s26 + $0x7c] ss:$12 sps:$4 sm:$0xff]   ;;  %v3080_v17 = vld [vmem:[%s4425_s26 + $0x80] ss:$12 sps:$4 sm:$0xff]   ;;  %v3079_v19 = vld [vmem:[%s4425_s26 + $0x78] ss:$12 sps:$4 sm:$0xff]  }
   0xe   :  { %226 = vmatpush1.bf16.msra.mxu0 %v3063_v5  ;;  %2774 = vmatpush3.bf16.msra.mxu1 %v3064_v6  ;;  %v57_v18 = vld [vmem:[%s4426_s19] sm:$0xff]  ;;  %v58_v20 = vld [vmem:[%s4426_s19 + $0x8] sm:$0xff]  ;;  %v3083_v24 = vld [vmem:[%s4425_s26 + $0x90] ss:$12 sps:$4 sm:$0xff]  }
   0xf   :  { %227 = vmatprep.subr.bf16.mxu0 %v3065_v7  ;;  %2775 = vmatprep.subr.bf16.mxu1 %v3068_v8  ;;  %v3081_v21 = vld [vmem:[%s4425_s26 + $0x94] ss:$12 sps:$4 sm:$0xff]   ;;  %v61_v22 = vpack.c.bf16 %v58_v20, %v57_v18  ;;  %v3084_v23 = vld [vmem:[%s4425_s26 + $0x98] ss:$12 sps:$4 sm:$0xff]   ;;  %v3088_v26 = vld [vmem:[%s4425_s26 + $0xb0] ss:$12 sps:$4 sm:$0xff]  }
  0x10   :  { %v3085_v25 = vld [vmem:[%s4425_s26 + $0xac] ss:$12 sps:$4 sm:$0xff]   ;;  %v3087_v27 = vld [vmem:[%s4425_s26 + $0xa8] ss:$12 sps:$4 sm:$0xff]  }
  0x11   :  { %2787 = vmatprep.mubr.bf16.mxu1 %v61_v22  ;;  %v59_v28 = vld [vmem:[%s4426_s19 + $0x10] sm:$0xff]  ;;  %v60_v29 = vld [vmem:[%s4426_s19 + $0x18] sm:$0xff] }
  0x12   :  { %228 = vmatpush1.bf16.msra.mxu0 %v3067_v9  ;;  %2776 = vmatpush3.bf16.msra.mxu1 %v3068_v8  ;;  %v62_v30 = vpack.c.bf16 %v60_v29, %v59_v28 }
  0x13   :  { %229 = vmatprep.subr.bf16.mxu0 %v3069_v10  ;;  %2777 = vmatprep.subr.bf16.mxu1 %v3072_v11 }
  0x16   :  { %230 = vmatpush1.bf16.msra.mxu0 %v3071_v12  ;;  %2778 = vmatpush3.bf16.msra.mxu1 %v3072_v11 }
  0x17   :  { %231 = vmatprep.subr.bf16.mxu0 %v3073_v13  ;;  %2779 = vmatprep.subr.bf16.mxu1 %v3076_v14 }
  0x1a   :  { %232 = vmatpush1.bf16.msra.mxu0 %v3075_v15  ;;  %2780 = vmatpush3.bf16.msra.mxu1 %v3076_v14 }
  0x1b   :  { %233 = vmatprep.subr.bf16.mxu0 %v3077_v16  ;;  %2781 = vmatprep.subr.bf16.mxu1 %v3080_v17 }
  0x1e   :  { %234 = vmatpush1.bf16.msra.mxu0 %v3079_v19  ;;  %2782 = vmatpush3.bf16.msra.mxu1 %v3080_v17 }
  0x1f   :  { %235 = vmatprep.subr.bf16.mxu0 %v3081_v21  ;;  %2783 = vmatprep.subr.bf16.mxu1 %v3084_v23 }
  0x22   :  { %236 = vmatpush1.bf16.msra.mxu0 %v3083_v24  ;;  %2784 = vmatpush3.bf16.msra.mxu1 %v3084_v23 }
  0x23   :  { %237 = vmatprep.subr.bf16.mxu0 %v3085_v25  ;;  %2785 = vmatprep.subr.bf16.mxu1 %v3088_v26 }
  0x26   :  { %238 = vmatpush1.bf16.msra.mxu0 %v3087_v27  ;;  %2786 = vmatpush3.bf16.msra.mxu1 %v3088_v26 }
  0x27   :  { %2916 = vmatprep.subr.bf16.mxu0 %v3268_v34 }
  0x29   :  { %256 = vmatmul.mubr.bf16.vlgmr.msra.gmra.mrb[0].mxu0 %v61_v22  ;;  %2788 = vmatmul.mubr.bf16.vlgmr.msra.gmra.mrb[0].mxu1 %v62_v30 }
  0x2a   :  { %265 = vmatprep.mubr.bf16.mxu0 %v3267_v1  ;;  %869 = vmatprep.mubr.bf16.mxu1 %v3267_v1 }
  0x2b   :  { %2918 = vmatpush3.bf16.msra.mxu0 %v2917_v33 }
  0x2c   :  { %2919 = vmatprep.subr.bf16.mxu0 %v3268_v34 }
  0x2f   :  { %2921 = vmatpush3.bf16.msra.mxu0 %v2920_v37 }
  0x30   :  { %2922 = vmatprep.subr.bf16.mxu0 %v3268_v34 }
  0x31   :  { %266 = vmatmul.mubr.bf16.gmra.mrb[4].mxu0 %v62_v30 }
  0x32   :  { %2823 = vmatprep.mubr.msk.f32.mxu0 %vm3269_vm0, %v3270_v52 }
  0x33   :  { %2924 = vmatpush3.bf16.msra.mxu0 %v2923_v40 }
  0x34   :  { %2925 = vmatprep.subr.bf16.mxu0 %v3268_v34 }
  0x37   :  { %2927 = vmatpush3.bf16.msra.mxu0 %v2926_v43 }
  0x38   :  { %2928 = vmatprep.subr.bf16.mxu0 %v3268_v34 }
  0x3b   :  { %2930 = vmatpush3.bf16.msra.mxu0 %v2929_v46 }
  0x3c   :  { %2931 = vmatprep.subr.bf16.mxu0 %v3268_v34 }
  0x3f   :  { %2933 = vmatpush3.bf16.msra.mxu0 %v2932_v49 }
  0x40   :  { %2934 = vmatprep.subr.bf16.mxu0 %v3268_v34 }
  0x43   :  { %2936 = vmatpush3.bf16.msra.mxu0 %v2935_v53 }
  0x44   :  { %2937 = vmatprep.subr.bf16.mxu0 %v3268_v34 }
  0x47   :  { %2939 = vmatpush3.bf16.msra.mxu0 %v2938_v56 }
  0xfc   :  { %v257_v57 = vpop.f32.mrb[0].mxu0  ;;  %v2789_v60 = vpop.f32.mrb[0].mxu1 }
  0xfd   :  { %v259_v58 = vpop.f32.mrb[1].mxu0  ;;  %v356_v61 = vrot.slane %v2789_v60, 2  ;;  %v310_v63 = vpop.f32.mrb[1].mxu1  ;;  %v3094_v60 = vld [vmem:[%s4406_s5 + $0xc] ss:$24 sps:$4 sm:$0xff]  }
  0xfe   :  { %v261_v59 = vpop.f32.mrb[2].mxu0  ;;  %v328_v0 = vrot.slane %v259_v58, 1  ;;  %v338_v3 = vrot.slane %v310_v63, 2  ;;  %v2790_v4 = vpop.f32.mrb[2].mxu1  ;;  %v3089_v58 = vld [vmem:[%s4406_s5] ss:$24 sps:$4 sm:$0xff]   ;;  %890 = vmatprep.subr.bf16.mxu0 %v3094_v60 }
  0xff   :  { %v263_v62 = vpop.f32.mrb[3].mxu0  ;;  %v357_v5 = vrot.slane %v2790_v4, 2  ;;  %v313_v6 = vpop.f32.mrb[3].mxu1  ;;  %v3100_v63 = vld [vmem:[%s4406_s5 + $0x3c] ss:$24 sps:$4 sm:$0xff]  }
 0x100   :  { %v329_v2 = vrot.slane %v263_v62, 1  ;;  %v339_v9 = vrot.slane %v313_v6, 2  ;;  %v3095_v62 = vld [vmem:[%s4406_s5 + $0x30] ss:$24 sps:$4 sm:$0xff]   ;;  %v3106_v4 = vld [vmem:[%s4406_s5 + $0x6c] ss:$24 sps:$4 sm:$0xff]  }
 0x101   :  { %v358_v11 = vsel %vm337_vm2, %v356_v61, %v357_v5  ;;  %v3097_v61 = vld [vmem:[%s4406_s5 + $0x34] ss:$24 sps:$4 sm:$0xff]  }
 0x102   :  { %v330_v7 = vsel %vm327_vm1, %v328_v0, %v329_v2  ;;  %v334_v8 = vadd.f32 %v329_v2, %v261_v59  ;;  %v340_v12 = vsel %vm337_vm2, %v338_v3, %v339_v9  ;;  %v3092_v59 = vld [vmem:[%s4406_s5 + $0x8] ss:$24 sps:$4 sm:$0xff]   ;;  %v3098_v0 = vld [vmem:[%s4406_s5 + $0x38] ss:$24 sps:$4 sm:$0xff]   ;;  %v3103_v2 = vld [vmem:[%s4406_s5 + $0x64] ss:$24 sps:$4 sm:$0xff]  }
 0x103   :  { %v333_v10 = vadd.f32 %v330_v7, %v257_v57  ;;  %v3091_v57 = vld [vmem:[%s4406_s5 + $0x4] ss:$24 sps:$4 sm:$0xff]   ;;  %v3101_v3 = vld [vmem:[%s4406_s5 + $0x60] ss:$24 sps:$4 sm:$0xff]   ;;  %v3109_v6 = vld [vmem:[%s4406_s5 + $0x94] ss:$24 sps:$4 sm:$0xff]  }
 0x104   :  { %v344_v13 = vadd.f32 %v339_v9, %v334_v8  ;;  %v267_v14 = vpop.f32.mrb[4].mxu0  ;;  %837 = vmatprep.subr.bf16.mxu1 %v3091_v57  ;;  %v3107_v7 = vld [vmem:[%s4406_s5 + $0x90] ss:$24 sps:$4 sm:$0xff]   ;;  %v3112_v8 = vld [vmem:[%s4406_s5 + $0x9c] ss:$24 sps:$4 sm:$0xff]  }
 0x105   :  { %v3510_v15 = vadd.f32 %v340_v12, %v333_v10  ;;  %v269_v16 = vpop.f32.mrb[5].mxu0  ;;  %838 = vmatpush1.bf16.msra.mxu1 %v3089_v58  ;;  %v3110_v9 = vld [vmem:[%s4406_s5 + $0x98] ss:$24 sps:$4 sm:$0xff]   ;;  %v3115_v10 = vld [vmem:[%s4406_s5 + $0xc4] ss:$24 sps:$4 sm:$0xff]  }
 0x106   :  { %v271_v17 = vpop.f32.mrb[6].mxu0  ;;  %v347_v19 = vrot.slane %v269_v16, 1  ;;  %839 = vmatprep.subr.bf16.mxu1 %v3097_v61  ;;  %v3118_v12 = vld [vmem:[%s4406_s5 + $0xcc] ss:$24 sps:$4 sm:$0xff]   ;;  %v3119_v16 = vld [vmem:[%s4406_s5 + $0xf0] ss:$24 sps:$4 sm:$0xff]  }
 0x107   :  { %v273_v18 = vpop.f32.mrb[7].mxu0  ;;  %v383_v30 = vmul.f32 %v3510_v15, %v3510_v15 }
 0x108   :  { %v348_v20 = vrot.slane %v273_v18, 1  ;;  %v3122_v18 = vld [vmem:[%s4406_s5 + $0xf8] ss:$24 sps:$4 sm:$0xff]  }
 0x109   :  { %840 = vmatpush1.bf16.msra.mxu1 %v3095_v62 }
 0x10a   :  { %v349_v21 = vsel %vm327_vm1, %v347_v19, %v348_v20  ;;  %v353_v22 = vadd.f32 %v348_v20, %v271_v17  ;;  %841 = vmatprep.subr.bf16.mxu1 %v3103_v2  ;;  %v3124_v17 = vld [vmem:[%s4406_s5 + $0xfc] ss:$24 sps:$4 sm:$0xff]   ;;  %v3125_v20 = vld [vmem:[%s4406_s5 + $0x120] ss:$24 sps:$4 sm:$0xff]  }
 0x10b   :  { %v352_v23 = vadd.f32 %v349_v21, %v267_v14  ;;  %v3121_v14 = vld [vmem:[%s4406_s5 + $0xf4] ss:$24 sps:$4 sm:$0xff]   ;;  %v3127_v19 = vld [vmem:[%s4406_s5 + $0x124] ss:$24 sps:$4 sm:$0xff]  }
 0x10c   :  { %v362_v24 = vadd.f32 %v357_v5, %v353_v22  ;;  %v3104_v5 = vld [vmem:[%s4406_s5 + $0x68] ss:$24 sps:$4 sm:$0xff]   ;;  %v3130_v21 = vld [vmem:[%s4406_s5 + $0x12c] ss:$24 sps:$4 sm:$0xff]  }
 0x10d   :  { %v361_v25 = vadd.f32 %v358_v11, %v352_v23  ;;  %842 = vmatpush1.bf16.msra.mxu1 %v3101_v3  ;;  %v3113_v11 = vld [vmem:[%s4406_s5 + $0xc0] ss:$24 sps:$4 sm:$0xff]   ;;  %v3133_v23 = vld [vmem:[%s4406_s5 + $0x154] ss:$24 sps:$4 sm:$0xff]  }
 0x10e   :  { %v3513_v26 = vrot.slane %v362_v24, 2  ;;  %843 = vmatprep.subr.bf16.mxu1 %v3109_v6  ;;  %v3128_v22 = vld [vmem:[%s4406_s5 + $0x128] ss:$24 sps:$4 sm:$0xff]  }
 0x10f   :  { %v365_v27 = vrot.slane %v361_v25, 2  ;;  %v3131_v24 = vld [vmem:[%s4406_s5 + $0x150] ss:$24 sps:$4 sm:$0xff]   ;;  %v3136_v25 = vld [vmem:[%s4406_s5 + $0x15c] ss:$24 sps:$4 sm:$0xff]  }
 0x110   :  { %v386_v33 = vmul.f32 %v3513_v26, %v3513_v26  ;;  %v375_v38 = vsel %vm374_vm3, %v3513_v26, 0.0 }
 0x111   :  { %v3517_v28 = vsel %vm337_vm2, %v365_v27, %v3513_v26  ;;  %v3520_v29 = vsel %vm337_vm2, %v344_v13, %v365_v27  ;;  %844 = vmatpush1.bf16.msra.mxu1 %v3107_v7  ;;  %v3116_v13 = vld [vmem:[%s4406_s5 + $0xc8] ss:$24 sps:$4 sm:$0xff]   ;;  %v3139_v27 = vld [vmem:[%s4406_s5 + $0x14] ss:$24 sps:$4 sm:$0xff]  }
 0x112   :  { %v372_v31 = vadd.f32 %v3520_v29, %v3510_v15  ;;  %v384_v32 = vmul.f32 %v3520_v29, %v3520_v29  ;;  %v385_v36 = vmul.f32 %v3517_v28, %v3517_v28  ;;  %v389_v41 = vsel %vm374_vm3, %v386_v33, 0.0  ;;  %845 = vmatprep.subr.bf16.mxu1 %v3115_v10 }
 0x114   :  { %v373_v35 = vadd.f32 %v372_v31, %v3517_v28  ;;  %v387_v37 = vadd.f32 %v384_v32, %v383_v30  ;;  %v3134_v30 = vld [vmem:[%s4406_s5 + $0x158] ss:$24 sps:$4 sm:$0xff]  }
 0x115   :  { %846 = vmatpush1.bf16.msra.mxu1 %v3113_v11 }
 0x116   :  { %v376_v39 = vadd.f32 %v375_v38, %v373_v35  ;;  %v388_v40 = vadd.f32 %v387_v37, %v385_v36  ;;  %847 = vmatprep.subr.bf16.mxu1 %v3121_v14  ;;  %v3148_v14 = vld [vmem:[%s4406_s5 + $0xa4] ss:$24 sps:$4 sm:$0xff]  }
 0x118   :  { %v377_v42 = vrot.slane %v376_v39, 4  ;;  %v390_v43 = vadd.f32 %v389_v41, %v388_v40  ;;  %v498_v41 = vlaneseq }
 0x119   :  { %848 = vmatpush1.bf16.msra.mxu1 %v3119_v16  ;;  %v3146_v16 = vld [vmem:[%s4406_s5 + $0xa0] ss:$24 sps:$4 sm:$0xff]  }
 0x11a   :  { %v378_v44 = vadd.f32 %v377_v42, %v376_v39  ;;  %v391_v45 = vrot.slane %v390_v43, 4  ;;  %849 = vmatprep.subr.bf16.mxu1 %v3127_v19  ;;  %v3271_v39 = vmov 1966171168   ;;  %v3154_v19 = vld [vmem:[%s4406_s5 + $0x104] ss:$24 sps:$4 sm:$0xff]  }
 0x11b   :  { %v496_v40 = vunpack.c.l.s4 %v3271_v39  ;;  %v1146_v39 = vld [vmem:[%s4409_s6 + $0x30] sm:$0xff] }
 0x11c   :  { %v379_v46 = vrot.slane %v378_v44, 2  ;;  %v392_v47 = vadd.f32 %v391_v45, %v390_v43  ;;  %v3637_v43 = vshrl.u32 %v498_v41, 7  ;;  %v1149_v41 = vld [vmem:[%s4409_s6 + $0x48] sm:$0xff] }
 0x11d   :  { %850 = vmatpush1.bf16.msra.mxu1 %v3125_v20  ;;  %v497_v42 = vunpack.c.0.s8 %v496_v40  ;;  %v3152_v20 = vld [vmem:[%s4406_s5 + $0x100] ss:$24 sps:$4 sm:$0xff]  }
 0x11e   :  { %v380_v48 = vadd.f32 %v379_v46, %v378_v44  ;;  %v393_v49 = vrot.slane %v392_v47, 2  ;;  %851 = vmatprep.subr.bf16.mxu1 %v3133_v23  ;;  %v3160_v23 = vld [vmem:[%s4406_s5 + $0x164] ss:$24 sps:$4 sm:$0xff]  }
 0x11f   :  { %v3640_v44 = vsub.s32 %v497_v42, %v3637_v43  ;;  %v1151_v42 = vld [vmem:[%s4409_s6 + $0x58] sm:$0xff] }
 0x120   :  { %v381_v50 = vrot.slane %v380_v48, 1  ;;  %v394_v51 = vadd.f32 %v393_v49, %v392_v47 }
 0x121   :  { %852 = vmatpush1.bf16.msra.mxu1 %v3131_v24  ;;  %v3158_v24 = vld [vmem:[%s4406_s5 + $0x160] ss:$24 sps:$4 sm:$0xff]  }
 0x122   :  { %v395_v53 = vrot.slane %v394_v51, 1  ;;  %v382_v54 = vadd.f32 %v381_v50, %v380_v48  ;;  %943 = vmatprep.subr.bf16.mxu1 %v3139_v27  ;;  %v491_v48 = vld [vmem:[%s4407_s3] sm:$0x1]  ;;  %v3648_v50 = vsub.s32 0, %v3637_v43  ;;  %v1143_v27 = vld [vmem:[%s4409_s6 + $0x18] sm:$0xff] }
 0x124   :  { %v396_v55 = vadd.f32 %v395_v53, %v394_v51  ;;  %v512_v53 = vld [vmem:[%s4408_s4] sm:$0x1] }
 0x126   :  { %v398_v56 = vsel %vm397_vm4, %v382_v54, %v396_v55 }
 0x127   :  { %2824 = vmatmul.mubr.f32.vlgmr.msra.gmra.mrb[8].mxu0 %v398_v56 }
 0x128   :  { %922 = vmatprep.mubr.bf16.mxu0 %v3267_v1  ;;  %891 = vmatpush1.bf16.msra.mxu0 %v3092_v59 }
 0x129   :  { %892 = vmatprep.subr.bf16.mxu0 %v3100_v63 }
 0x12c   :  { %893 = vmatpush1.bf16.msra.mxu0 %v3098_v0 }
 0x12d   :  { %894 = vmatprep.subr.bf16.mxu0 %v3106_v4 }
 0x130   :  { %895 = vmatpush1.bf16.msra.mxu0 %v3104_v5  ;;  %v3137_v5 = vld [vmem:[%s4406_s5 + $0x10] ss:$24 sps:$4 sm:$0xff]  }
 0x131   :  { %896 = vmatprep.subr.bf16.mxu0 %v3112_v8  ;;  %v3140_v8 = vld [vmem:[%s4406_s5 + $0x40] ss:$24 sps:$4 sm:$0xff]  }
 0x134   :  { %897 = vmatpush1.bf16.msra.mxu0 %v3110_v9  ;;  %v3145_v9 = vld [vmem:[%s4406_s5 + $0x74] ss:$24 sps:$4 sm:$0xff]  }
 0x135   :  { %898 = vmatprep.subr.bf16.mxu0 %v3118_v12  ;;  %v3143_v12 = vld [vmem:[%s4406_s5 + $0x70] ss:$24 sps:$4 sm:$0xff]  }
 0x138   :  { %899 = vmatpush1.bf16.msra.mxu0 %v3116_v13 }
 0x139   :  { %900 = vmatprep.subr.bf16.mxu0 %v3124_v17  ;;  %v3151_v17 = vld [vmem:[%s4406_s5 + $0xd4] ss:$24 sps:$4 sm:$0xff]  }
 0x13c   :  { %901 = vmatpush1.bf16.msra.mxu0 %v3122_v18  ;;  %v3149_v18 = vld [vmem:[%s4406_s5 + $0xd0] ss:$24 sps:$4 sm:$0xff]  }
 0x13d   :  { %902 = vmatprep.subr.bf16.mxu0 %v3130_v21  ;;  %v3157_v21 = vld [vmem:[%s4406_s5 + $0x134] ss:$24 sps:$4 sm:$0xff]  }
 0x140   :  { %903 = vmatpush1.bf16.msra.mxu0 %v3128_v22  ;;  %v3155_v22 = vld [vmem:[%s4406_s5 + $0x130] ss:$24 sps:$4 sm:$0xff]  }
 0x141   :  { %904 = vmatprep.subr.bf16.mxu0 %v3136_v25  ;;  %v1141_v25 = vld [vmem:[%s4409_s6 + $0x8] sm:$0xff] }
 0x144   :  { %905 = vmatpush1.bf16.msra.mxu0 %v3134_v30  ;;  %v2940_v30 = vpack.c.bf16 %v1143_v27, %v1141_v25  ;;  %v1178_v25 = vld [vmem:[%s4409_s6 + $0x130] sm:$0xff] }
 0x146   :  { %2941 = vmatprep.subr.bf16.mxu0 %v2940_v30  ;;  %v1181_v30 = vld [vmem:[%s4409_s6 + $0x148] sm:$0xff] }
 0x1fa   :  { %v481_v31 = vpop.f32.mrb[8].mxu0 }
 0x1fb   :  { %v485_v32 = vmul.f32 %v481_v31, %v481_v31  ;;  %v2825_v33 = vpop.f32.mrb[9].mxu0 }
 0x1fd   :  { %v487_v35 = vrot.slane %v485_v32, 7  ;;  %v1142_v32 = vld [vmem:[%s4409_s6 + $0x10] sm:$0xff] }
 0x1ff   :  { %v489_v36 = vsub.f32 %v481_v31, %v487_v35  ;;  %v1145_v35 = vld [vmem:[%s4409_s6 + $0x28] sm:$0xff] }
 0x201   :  { %v490_v37 = vmax.f32 %v489_v36, 0.0  ;;  %v1147_v36 = vld [vmem:[%s4409_s6 + $0x38] sm:$0xff] }
 0x203   :  { %v492_v38 = vadd.f32 1e-05, %v490_v37  ;;  %v2944_v37 = vpack.c.bf16 %v1147_v36, %v1145_v35  ;;  %v1182_v35 = vld [vmem:[%s4409_s6 + $0x150] sm:$0xff] }
 0x205   :  { %3257 = vrsqrt.f32 %v492_v38  ;;  %v1144_v38 = vld [vmem:[%s4409_s6 + $0x20] sm:$0xff] }
 0x206   :  { %v2946_v40 = vpack.c.bf16 %v1146_v39, %v1144_v38  ;;  %v1187_v38 = vld [vmem:[%s4409_s6 + $0x178] sm:$0xff] }
 0x20f   :  { %v3258_v45 = vpop.eup %3257 }
 0x210   :  { %v501_v46 = vrot.slane %v3258_v45, %v3640_v44  ;;  %v2948_v45 = vpack.c.bf16 %v1151_v42, %v1149_v41  ;;  %v1186_v41 = vld [vmem:[%s4409_s6 + $0x170] sm:$0xff] }
 0x212   :  { %v502_v47 = vcombine.high %v501_v46, %v501_v46  ;;  %v1148_v46 = vld [vmem:[%s4409_s6 + $0x40] sm:$0xff] }
 0x214   :  { %v509_v49 = vrot.slane %v502_v47, %v3640_v44  ;;  %v1150_v47 = vld [vmem:[%s4409_s6 + $0x50] sm:$0xff] }
 0x216   :  { %v511_v51 = vmul.f32 %v509_v49, %v491_v48  ;;  %v1153_v48 = vld [vmem:[%s4409_s6 + $0x68] sm:$0xff]  ;;  %v2950_v49 = vpack.c.bf16 %v1150_v47, %v1148_v46  ;;  %v1191_v46 = vld [vmem:[%s4409_s6 + $0x198] sm:$0xff] }
 0x218   :  { %v513_v54 = vmul.f32 %v511_v51, %v481_v31  ;;  %v519_v55 = vrot.slane %v511_v51, %v3648_v50  ;;  %v1140_v31 = vld [vmem:[%s4409_s6] sm:$0xff]  ;;  %v1155_v51 = vld [vmem:[%s4409_s6 + $0x78] sm:$0xff] }
 0x219   :  { %v2942_v33 = vpack.c.bf16 %v1142_v32, %v1140_v31  ;;  %v1183_v31 = vld [vmem:[%s4409_s6 + $0x158] sm:$0xff] }
 0x21a   :  { %v514_v56 = vsub.f32 %v512_v53, %v513_v54  ;;  %v521_v58 = vmul.f32 %v519_v55, %v3510_v15  ;;  %v522_v59 = vmul.f32 %v519_v55, %v3520_v29  ;;  %v523_v60 = vmul.f32 %v519_v55, %v3517_v28  ;;  %v3142_v28 = vld [vmem:[%s4406_s5 + $0x44] ss:$24 sps:$4 sm:$0xff]   ;;  %v1154_v54 = vld [vmem:[%s4409_s6 + $0x70] sm:$0xff] }
 0x21b   :  { %v524_v61 = vmul.f32 %v519_v55, %v3513_v26  ;;  %v1152_v53 = vld [vmem:[%s4409_s6 + $0x60] sm:$0xff]  ;;  %v2952_v55 = vpack.c.bf16 %v1155_v51, %v1153_v48  ;;  %v2980_v32 = vpack.c.bf16 %v1183_v31, %v1181_v30 }
 0x21c   :  { %v529_v57 = vrot.slane %v514_v56, %v3648_v50  ;;  %v1157_v56 = vld [vmem:[%s4409_s6 + $0x88] sm:$0xff]  ;;  %v1188_v48 = vld [vmem:[%s4409_s6 + $0x180] sm:$0xff] }
 0x21e   :  { %v531_v62 = vadd.f32 %v529_v57, %v521_v58  ;;  %v532_v63 = vadd.f32 %v529_v57, %v522_v59  ;;  %v533_v0 = vadd.f32 %v529_v57, %v523_v60  ;;  %v534_v2 = vadd.f32 %v529_v57, %v524_v61  ;;  %v1159_v57 = vld [vmem:[%s4409_s6 + $0x98] sm:$0xff]  ;;  %v1156_v60 = vld [vmem:[%s4409_s6 + $0x80] sm:$0xff]  ;;  %v1158_v61 = vld [vmem:[%s4409_s6 + $0x90] sm:$0xff] }
 0x21f   :  { %v2954_v58 = vpack.c.bf16 %v1154_v54, %v1152_v53  ;;  %v2956_v59 = vpack.c.bf16 %v1159_v57, %v1157_v56  ;;  %v1193_v53 = vld [vmem:[%s4409_s6 + $0x1a8] sm:$0xff]  ;;  %v1195_v54 = vld [vmem:[%s4409_s6 + $0x1b8] sm:$0xff]  ;;  %v1192_v56 = vld [vmem:[%s4409_s6 + $0x1a0] sm:$0xff] }
 0x220   :  { %vm535_vm5 = vcmp.gt.f32.partialorder %v531_v62, 0.0  ;;  %vm536_vm6 = vcmp.gt.f32.partialorder %v532_v63, 0.0  ;;  %v539_v3 = vmul.f32 0.01, %v531_v62  ;;  %v540_v4 = vmul.f32 0.01, %v532_v63 }
 0x221   :  { %v541_v26 = vmul.f32 0.01, %v533_v0  ;;  %v542_v29 = vmul.f32 0.01, %v534_v2  ;;  %vm537_vm7 = vcmp.gt.f32.partialorder %v533_v0, 0.0  ;;  %vm538_vm8 = vcmp.gt.f32.partialorder %v534_v2, 0.0 }
 0x222   :  { %v543_v6 = vsel %vm535_vm5, %v531_v62, %v539_v3  ;;  %v544_v15 = vsel %vm536_vm6, %v532_v63, %v540_v4  ;;  %v1161_v62 = vld [vmem:[%s4409_s6 + $0xa8] sm:$0xff]  ;;  %v1163_v63 = vld [vmem:[%s4409_s6 + $0xb8] sm:$0xff]  ;;  %v1160_v3 = vld [vmem:[%s4409_s6 + $0xa0] sm:$0xff]  ;;  %vm1818_vm5 = vcmask 1044480  }
 0x223   :  { %v547_v7 = vpack.c.bf16 %v544_v15, %v543_v6  ;;  %v545_v10 = vsel %vm537_vm7, %v533_v0, %v541_v26  ;;  %v546_v11 = vsel %vm538_vm8, %v534_v2, %v542_v29  ;;  %v2958_v0 = vpack.c.bf16 %v1158_v61, %v1156_v60  ;;  %v1162_v4 = vld [vmem:[%s4409_s6 + $0xb0] sm:$0xff]  ;;  %v1165_v6 = vld [vmem:[%s4409_s6 + $0xc8] sm:$0xff]  ;;  %v1167_v15 = vld [vmem:[%s4409_s6 + $0xd8] sm:$0xff] }
 0x224   :  { %v548_v13 = vpack.c.bf16 %v546_v11, %v545_v10  ;;  %v2960_v2 = vpack.c.bf16 %v1163_v63, %v1161_v62  ;;  %v1166_v26 = vld [vmem:[%s4409_s6 + $0xd0] sm:$0xff]  ;;  %v1168_v11 = vld [vmem:[%s4409_s6 + $0xe0] sm:$0xff]  ;;  %v1199_v60 = vld [vmem:[%s4409_s6 + $0x1d8] sm:$0xff] }
 0x225   :  { %870 = vmatmul.mubr.bf16.vlgmr.msra.gmra.mrb[4].mxu1 %v547_v7  ;;  %923 = vmatmul.mubr.bf16.vlgmr.msra.gmra.mrb[12].mxu0 %v547_v7  ;;  %v1194_v57 = vld [vmem:[%s4409_s6 + $0x1b0] sm:$0xff]  ;;  %v1196_v61 = vld [vmem:[%s4409_s6 + $0x1c0] sm:$0xff] }
 0x226   :  { %944 = vmatpush1.bf16.msra.mxu1 %v3137_v5  ;;  %879 = vmatprep.mubr.bf16.mxu1 %v3267_v1  ;;  %v2962_v5 = vpack.c.bf16 %v1162_v4, %v1160_v3  ;;  %v1198_v63 = vld [vmem:[%s4409_s6 + $0x1d0] sm:$0xff] }
 0x227   :  { %945 = vmatprep.subr.bf16.mxu1 %v3142_v28  ;;  %932 = vmatprep.mubr.bf16.mxu0 %v3267_v1  ;;  %v1164_v28 = vld [vmem:[%s4409_s6 + $0xc0] sm:$0xff]  ;;  %v2998_v3 = vpack.c.bf16 %v1198_v63, %v1196_v61 }
 0x228   :  { %2943 = vmatpush1.bf16.msra.mxu0 %v2942_v33  ;;  %v2966_v29 = vpack.c.bf16 %v1166_v26, %v1164_v28  ;;  %v1180_v33 = vld [vmem:[%s4409_s6 + $0x140] sm:$0xff]  ;;  %v3166_v26 = vld [vmem:[%s4410_s9 + $0x1c] ss:$12 sps:$4 sm:$0xff]  }
 0x229   :  { %2945 = vmatprep.subr.bf16.mxu0 %v2944_v37  ;;  %v2982_v36 = vpack.c.bf16 %v1182_v35, %v1180_v33  ;;  %v1185_v37 = vld [vmem:[%s4409_s6 + $0x168] sm:$0xff]  ;;  %v3163_v28 = vld [vmem:[%s4410_s9 + $0x4] ss:$12 sps:$4 sm:$0xff]  }
 0x22a   :  { %946 = vmatpush1.bf16.msra.mxu1 %v3140_v8  ;;  %v1169_v8 = vld [vmem:[%s4409_s6 + $0xe8] sm:$0xff]  ;;  %v2984_v39 = vpack.c.bf16 %v1187_v38, %v1185_v37 }
 0x22b   :  { %947 = vmatprep.subr.bf16.mxu1 %v3145_v9  ;;  %v1171_v9 = vld [vmem:[%s4409_s6 + $0xf8] sm:$0xff] }
 0x22c   :  { %2947 = vmatpush1.bf16.msra.mxu0 %v2946_v40  ;;  %v2968_v10 = vpack.c.bf16 %v1171_v9, %v1169_v8  ;;  %v1184_v40 = vld [vmem:[%s4409_s6 + $0x160] sm:$0xff]  ;;  %v3167_v9 = vld [vmem:[%s4410_s9 + $0x30] ss:$12 sps:$4 sm:$0xff]  }
 0x22d   :  { %880 = vmatmul.mubr.bf16.gmra.mrb[8].mxu1 %v548_v13  ;;  %933 = vmatmul.mubr.bf16.gmra.mrb[16].mxu0 %v548_v13  ;;  %v2986_v42 = vpack.c.bf16 %v1186_v41, %v1184_v40  ;;  %v3169_v8 = vld [vmem:[%s4410_s9 + $0x34] ss:$12 sps:$4 sm:$0xff]  }
 0x22e   :  { %948 = vmatpush1.bf16.msra.mxu1 %v3143_v12  ;;  %975 = vmatprep.mubr.bf16.mxu1 %v3267_v1  ;;  %v1170_v12 = vld [vmem:[%s4409_s6 + $0xf0] sm:$0xff] }
 0x22f   :  { %949 = vmatprep.subr.bf16.mxu1 %v3148_v14  ;;  %2949 = vmatprep.subr.bf16.mxu0 %v2948_v45  ;;  %v1173_v14 = vld [vmem:[%s4409_s6 + $0x108] sm:$0xff] }
 0x230   :  { %2951 = vmatpush1.bf16.msra.mxu0 %v2950_v49  ;;  %v1189_v45 = vld [vmem:[%s4409_s6 + $0x188] sm:$0xff]  ;;  %v1190_v49 = vld [vmem:[%s4409_s6 + $0x190] sm:$0xff] }
 0x231   :  { %2953 = vmatprep.subr.bf16.mxu0 %v2952_v55  ;;  %v2988_v47 = vpack.c.bf16 %v1191_v46, %v1189_v45  ;;  %v2990_v51 = vpack.c.bf16 %v1190_v49, %v1188_v48  ;;  %v2992_v55 = vpack.c.bf16 %v1195_v54, %v1193_v53 }
 0x232   :  { %950 = vmatpush1.bf16.msra.mxu1 %v3146_v16  ;;  %v1175_v16 = vld [vmem:[%s4409_s6 + $0x118] sm:$0xff] }
 0x233   :  { %951 = vmatprep.subr.bf16.mxu1 %v3151_v17  ;;  %v2972_v17 = vpack.c.bf16 %v1175_v16, %v1173_v14 }
 0x234   :  { %2955 = vmatpush1.bf16.msra.mxu0 %v2954_v58  ;;  %v2994_v58 = vpack.c.bf16 %v1194_v57, %v1192_v56 }
 0x235   :  { %2957 = vmatprep.subr.bf16.mxu0 %v2956_v59  ;;  %v1197_v59 = vld [vmem:[%s4409_s6 + $0x1c8] sm:$0xff] }
 0x236   :  { %952 = vmatpush1.bf16.msra.mxu1 %v3149_v18  ;;  %v1172_v18 = vld [vmem:[%s4409_s6 + $0x100] sm:$0xff]  ;;  %v2996_v62 = vpack.c.bf16 %v1199_v60, %v1197_v59 }
 0x237   :  { %953 = vmatprep.subr.bf16.mxu1 %v3154_v19  ;;  %v1174_v19 = vld [vmem:[%s4409_s6 + $0x110] sm:$0xff] }
 0x238   :  { %2959 = vmatpush1.bf16.msra.mxu0 %v2958_v0  ;;  %v1201_v0 = vld [vmem:[%s4409_s6 + $0x1e8] sm:$0xff] }
 0x239   :  { %2961 = vmatprep.subr.bf16.mxu0 %v2960_v2  ;;  %v1203_v2 = vld [vmem:[%s4409_s6 + $0x1f8] sm:$0xff] }
 0x23a   :  { %954 = vmatpush1.bf16.msra.mxu1 %v3152_v20  ;;  %v2974_v20 = vpack.c.bf16 %v1174_v19, %v1172_v18  ;;  %v3000_v4 = vpack.c.bf16 %v1203_v2, %v1201_v0 }
 0x23b   :  { %955 = vmatprep.subr.bf16.mxu1 %v3157_v21  ;;  %v1177_v21 = vld [vmem:[%s4409_s6 + $0x128] sm:$0xff] }
 0x23c   :  { %2963 = vmatpush1.bf16.msra.mxu0 %v2962_v5  ;;  %v1200_v5 = vld [vmem:[%s4409_s6 + $0x1e0] sm:$0xff] }
 0x23e   :  { %956 = vmatpush1.bf16.msra.mxu1 %v3155_v22  ;;  %v1179_v22 = vld [vmem:[%s4409_s6 + $0x138] sm:$0xff] }
 0x23f   :  { %957 = vmatprep.subr.bf16.mxu1 %v3160_v23  ;;  %v2976_v23 = vpack.c.bf16 %v1179_v22, %v1177_v21 }
 0x242   :  { %958 = vmatpush1.bf16.msra.mxu1 %v3158_v24  ;;  %v1176_v24 = vld [vmem:[%s4409_s6 + $0x120] sm:$0xff] }
 0x243   :  { %v2978_v27 = vpack.c.bf16 %v1178_v25, %v1176_v24  ;;  %1710 = vmatprep.subr.bf16.mxu1 %v3163_v28 }
 0x245   :  { %976 = vmatmul.mubr.bf16.vlgmr.msra.gmra.mrb[12].mxu1 %v547_v7  ;;  %v2964_v7 = vpack.c.bf16 %v1167_v15, %v1165_v6  ;;  %v1202_v6 = vld [vmem:[%s4409_s6 + $0x1f0] sm:$0xff] }
 0x246   :  { %985 = vmatprep.mubr.bf16.mxu1 %v3267_v1  ;;  %v3002_v15 = vpack.c.bf16 %v1202_v6, %v1200_v5 }
 0x247   :  { %2965 = vmatprep.subr.bf16.mxu0 %v2964_v7  ;;  %v3161_v7 = vld [vmem:[%s4410_s9] ss:$12 sps:$4 sm:$0xff]  }
 0x248   :  { %2967 = vmatpush1.bf16.msra.mxu0 %v2966_v29  ;;  %v3164_v29 = vld [vmem:[%s4410_s9 + $0x18] ss:$12 sps:$4 sm:$0xff]   ;;  %1711 = vmatpush1.bf16.msra.mxu1 %v3161_v7 }
 0x249   :  { %2969 = vmatprep.subr.bf16.mxu0 %v2968_v10  ;;  %1712 = vmatprep.subr.bf16.mxu1 %v3166_v26 }
 0x24c   :  { %1713 = vmatpush1.bf16.msra.mxu1 %v3164_v29 }
 0x24d   :  { %986 = vmatmul.mubr.bf16.gmra.mrb[16].mxu1 %v548_v13  ;;  %v2970_v13 = vpack.c.bf16 %v1170_v12, %v1168_v11  ;;  %1714 = vmatprep.subr.bf16.mxu1 %v3169_v8 }
 0x24f   :  { %2971 = vmatpush1.bf16.msra.mxu0 %v2970_v13 }
 0x250   :  { %2973 = vmatprep.subr.bf16.mxu0 %v2972_v17  ;;  %1715 = vmatpush1.bf16.msra.mxu1 %v3167_v9 }
 0x253   :  { %2975 = vmatpush1.bf16.msra.mxu0 %v2974_v20 }
 0x254   :  { %2977 = vmatprep.subr.bf16.mxu0 %v2976_v23 }
 0x257   :  { %2979 = vmatpush1.bf16.msra.mxu0 %v2978_v27 }
 0x258   :  { %2981 = vmatprep.subr.bf16.mxu0 %v2980_v32 }
 0x25b   :  { %2983 = vmatpush1.bf16.msra.mxu0 %v2982_v36 }
 0x25c   :  { %2985 = vmatprep.subr.bf16.mxu0 %v2984_v39 }
 0x25f   :  { %2987 = vmatpush1.bf16.msra.mxu0 %v2986_v42 }
 0x260   :  { %2989 = vmatprep.subr.bf16.mxu0 %v2988_v47 }
 0x263   :  { %2991 = vmatpush1.bf16.msra.mxu0 %v2990_v51 }
 0x264   :  { %2993 = vmatprep.subr.bf16.mxu0 %v2992_v55 }
 0x267   :  { %2995 = vmatpush1.bf16.msra.mxu0 %v2994_v58 }
 0x268   :  { %2997 = vmatprep.subr.bf16.mxu0 %v2996_v62 }
 0x26b   :  { %2999 = vmatpush1.bf16.msra.mxu0 %v2998_v3 }
 0x26c   :  { %3001 = vmatprep.subr.bf16.mxu0 %v3000_v4 }
 0x26f   :  { %3003 = vmatpush1.bf16.msra.mxu0 %v3002_v15 }
 0x2f8   :  { %v871_v10 = vpop.f32.mrb[4].mxu1  ;;  %v924_v11 = vpop.f32.mrb[12].mxu0 }
 0x2f9   :  { %v873_v12 = vpop.f32.mrb[5].mxu1  ;;  %v926_v13 = vpop.f32.mrb[13].mxu0  ;;  %v1000_v17 = vrot.slane %v924_v11, 1 }
 0x2fa   :  { %v875_v14 = vpop.f32.mrb[6].mxu1  ;;  %v928_v16 = vpop.f32.mrb[14].mxu0  ;;  %v1003_v21 = vrot.slane %v926_v13, 1 }
 0x2fb   :  { %v1001_v18 = vrot.slane %v928_v16, 1  ;;  %v877_v19 = vpop.f32.mrb[7].mxu1  ;;  %v930_v20 = vpop.f32.mrb[15].mxu0 }
 0x2fc   :  { %v1004_v22 = vrot.slane %v930_v20, 1 }
 0x2fd   :  { %v1002_v23 = vsel %vm327_vm1, %v1000_v17, %v1001_v18  ;;  %v1012_v24 = vadd.f32 %v1001_v18, %v875_v14 }
 0x2fe   :  { %v1010_v25 = vadd.f32 %v1002_v23, %v871_v10  ;;  %v1005_v27 = vsel %vm327_vm1, %v1003_v21, %v1004_v22  ;;  %v1013_v30 = vadd.f32 %v1004_v22, %v877_v19 }
 0x2ff   :  { %v1011_v31 = vadd.f32 %v1005_v27, %v873_v12 }
 0x300   :  { %v881_v32 = vpop.f32.mrb[8].mxu1  ;;  %v934_v33 = vpop.f32.mrb[16].mxu0 }
 0x301   :  { %v1036_v35 = vrot.slane %v934_v33, 1  ;;  %v883_v36 = vpop.f32.mrb[9].mxu1  ;;  %v936_v37 = vpop.f32.mrb[17].mxu0 }
 0x302   :  { %v1038_v38 = vrot.slane %v936_v37, 1  ;;  %v885_v39 = vpop.f32.mrb[10].mxu1  ;;  %v938_v40 = vpop.f32.mrb[18].mxu0 }
 0x303   :  { %v1037_v41 = vsel %vm327_vm1, %v1001_v18, %v1036_v35  ;;  %v1040_v42 = vrot.slane %v938_v40, 1  ;;  %v887_v45 = vpop.f32.mrb[11].mxu1  ;;  %v940_v46 = vpop.f32.mrb[19].mxu0 }
 0x304   :  { %v1039_v47 = vsel %vm327_vm1, %v1004_v22, %v1038_v38  ;;  %v1042_v48 = vrot.slane %v940_v46, 1  ;;  %v1050_v49 = vadd.f32 %v1037_v41, %v875_v14 }
 0x305   :  { %v1041_v51 = vsel %vm327_vm1, %v1036_v35, %v1040_v42  ;;  %v1054_v53 = vadd.f32 %v1040_v42, %v885_v39  ;;  %v1051_v54 = vadd.f32 %v1039_v47, %v877_v19 }
 0x306   :  { %v1052_v55 = vadd.f32 %v1041_v51, %v881_v32  ;;  %v1043_v56 = vsel %vm327_vm1, %v1038_v38, %v1042_v48  ;;  %v1055_v57 = vadd.f32 %v1042_v48, %v887_v45 }
 0x307   :  { %v1053_v58 = vadd.f32 %v1043_v56, %v883_v36 }
 0x318   :  { %v977_v59 = vpop.f32.mrb[12].mxu1 }
 0x319   :  { %v979_v60 = vpop.f32.mrb[13].mxu1  ;;  %v1018_v62 = vrot.slane %v977_v59, 2 }
 0x31a   :  { %v981_v61 = vpop.f32.mrb[14].mxu1  ;;  %v1021_v2 = vrot.slane %v979_v60, 2 }
 0x31b   :  { %v1019_v63 = vrot.slane %v981_v61, 2  ;;  %v983_v0 = vpop.f32.mrb[15].mxu1 }
 0x31c   :  { %v1022_v3 = vrot.slane %v983_v0, 2 }
 0x31d   :  { %v1020_v4 = vsel %vm337_vm2, %v1018_v62, %v1019_v63  ;;  %v1030_v5 = vadd.f32 %v1019_v63, %v1012_v24 }
 0x31e   :  { %v3925_v6 = vadd.f32 %v1020_v4, %v1010_v25  ;;  %v1023_v15 = vsel %vm337_vm2, %v1021_v2, %v1022_v3  ;;  %v1031_v7 = vadd.f32 %v1022_v3, %v1013_v30 }
 0x31f   :  { %v3928_v28 = vadd.f32 %v1023_v15, %v1011_v31 }
 0x320   :  { %v987_v26 = vpop.f32.mrb[16].mxu1  ;;  %v1116_v38 = vmul.f32 %v3925_v6, %v3925_v6 }
 0x321   :  { %v1060_v29 = vrot.slane %v987_v26, 2  ;;  %v989_v8 = vpop.f32.mrb[17].mxu1  ;;  %v1117_v42 = vmul.f32 %v3928_v28, %v3928_v28 }
 0x322   :  { %v1061_v9 = vrot.slane %v989_v8, 2  ;;  %v991_v10 = vpop.f32.mrb[18].mxu1 }
 0x323   :  { %v1072_v11 = vadd.f32 %v1060_v29, %v1050_v49  ;;  %v1062_v12 = vrot.slane %v991_v10, 2  ;;  %v993_v13 = vpop.f32.mrb[19].mxu1 }
 0x324   :  { %v1073_v14 = vadd.f32 %v1061_v9, %v1051_v54  ;;  %v1064_v16 = vrot.slane %v993_v13, 2 }
 0x325   :  { %v1063_v17 = vsel %vm337_vm2, %v1060_v29, %v1062_v12  ;;  %v1076_v18 = vadd.f32 %v1062_v12, %v1054_v53  ;;  %v1084_v24 = vrot.slane %v1072_v11, 2 }
 0x326   :  { %v1074_v19 = vadd.f32 %v1063_v17, %v1052_v55  ;;  %v1065_v20 = vsel %vm337_vm2, %v1061_v9, %v1064_v16  ;;  %v1077_v21 = vadd.f32 %v1064_v16, %v1055_v57  ;;  %v1087_v30 = vrot.slane %v1073_v14, 2 }
 0x327   :  { %v1090_v22 = vrot.slane %v1076_v18, 2  ;;  %v1075_v23 = vadd.f32 %v1065_v20, %v1053_v58  ;;  %v3170_v20 = vld [vmem:[%s4410_s9 + $0x48] ss:$12 sps:$4 sm:$0xff]  }
 0x328   :  { %v1085_v25 = vrot.slane %v1074_v19, 2  ;;  %v1092_v27 = vrot.slane %v1077_v21, 2  ;;  %v3172_v19 = vld [vmem:[%s4410_s9 + $0x4c] ss:$12 sps:$4 sm:$0xff]   ;;  %v3175_v21 = vld [vmem:[%s4410_s9 + $0x64] ss:$12 sps:$4 sm:$0xff]  }
 0x329   :  { %v1088_v31 = vrot.slane %v1075_v23, 2  ;;  %1716 = vmatprep.subr.bf16.mxu1 %v3172_v19  ;;  %v3178_v23 = vld [vmem:[%s4410_s9 + $0x7c] ss:$12 sps:$4 sm:$0xff]  }
 0x32a   :  { %v1086_v32 = vsel %vm337_vm2, %v1084_v24, %v1085_v25  ;;  %v3934_v33 = vsel %vm337_vm2, %v1085_v25, %v1090_v22  ;;  %1717 = vmatpush1.bf16.msra.mxu1 %v3170_v20  ;;  %v3173_v22 = vld [vmem:[%s4410_s9 + $0x60] ss:$12 sps:$4 sm:$0xff]   ;;  %v3176_v24 = vld [vmem:[%s4410_s9 + $0x78] ss:$12 sps:$4 sm:$0xff]  }
 0x32b   :  { %v3937_v35 = vsel %vm374_vm3, %v1030_v5, %v1086_v32  ;;  %v1089_v36 = vsel %vm337_vm2, %v1087_v30, %v1088_v31  ;;  %v3941_v37 = vsel %vm337_vm2, %v1088_v31, %v1092_v27  ;;  %v1120_v48 = vmul.f32 %v3934_v33, %v3934_v33  ;;  %1718 = vmatprep.subr.bf16.mxu1 %v3175_v21  ;;  %v3181_v25 = vld [vmem:[%s4410_s9 + $0x94] ss:$12 sps:$4 sm:$0xff]   ;;  %v3179_v27 = vld [vmem:[%s4410_s9 + $0x90] ss:$12 sps:$4 sm:$0xff]   ;;  %v3184_v30 = vld [vmem:[%s4410_s9 + $0xac] ss:$12 sps:$4 sm:$0xff]  }
 0x32c   :  { %v1100_v39 = vadd.f32 %v3937_v35, %v3925_v6  ;;  %v1118_v40 = vmul.f32 %v3937_v35, %v3937_v35  ;;  %v3950_v41 = vsel %vm374_vm3, %v1031_v7, %v1089_v36  ;;  %v1121_v53 = vmul.f32 %v3941_v37, %v3941_v37  ;;  %v3182_v31 = vld [vmem:[%s4410_s9 + $0xa8] ss:$12 sps:$4 sm:$0xff]   ;;  %v3187_v32 = vld [vmem:[%s4410_s9 + $0xc4] ss:$12 sps:$4 sm:$0xff]  }
 0x32d   :  { %v1108_v45 = vadd.f32 %v3950_v41, %v3928_v28  ;;  %v1119_v46 = vmul.f32 %v3950_v41, %v3950_v41  ;;  %v3188_v36 = vld [vmem:[%s4410_s9 + $0xc8] ss:$12 sps:$4 sm:$0xff]  }
 0x32e   :  { %v1101_v47 = vadd.f32 %v1100_v39, %v3934_v33  ;;  %v1122_v49 = vadd.f32 %v1118_v40, %v1116_v38  ;;  %1719 = vmatpush1.bf16.msra.mxu1 %v3173_v22  ;;  %v3185_v38 = vld [vmem:[%s4410_s9 + $0xc0] ss:$12 sps:$4 sm:$0xff]   ;;  %v3189_v39 = vld [vmem:[%s4410_s9 + $0x8] ss:$12 sps:$4 sm:$0xff]   ;;  %2699 = vmatprep.subr.bf16.mxu0 %v3188_v36 }
 0x32f   :  { %v1109_v51 = vadd.f32 %v1108_v45, %v3941_v37  ;;  %v1130_v54 = vadd.f32 %v1119_v46, %v1117_v42  ;;  %1720 = vmatprep.subr.bf16.mxu1 %v3178_v23  ;;  %v3192_v40 = vld [vmem:[%s4410_s9 + $0xdc] ss:$12 sps:$4 sm:$0xff]   ;;  %v3193_v42 = vld [vmem:[%s4410_s9 + $0xe0] ss:$12 sps:$4 sm:$0xff]   ;;  %v3190_v45 = vld [vmem:[%s4410_s9 + $0xd8] ss:$12 sps:$4 sm:$0xff]  }
 0x330   :  { %v1102_v55 = vrot.slane %v1101_v47, 4  ;;  %v1123_v56 = vadd.f32 %v1122_v49, %v1120_v48  ;;  %v3194_v46 = vld [vmem:[%s4410_s9 + $0x20] ss:$12 sps:$4 sm:$0xff]   ;;  %v3198_v48 = vld [vmem:[%s4410_s9 + $0xf8] ss:$12 sps:$4 sm:$0xff]  }
 0x331   :  { %v1110_v57 = vrot.slane %v1109_v51, 4  ;;  %v1131_v58 = vadd.f32 %v1130_v54, %v1121_v53  ;;  %v3195_v49 = vld [vmem:[%s4410_s9 + $0xf0] ss:$12 sps:$4 sm:$0xff]   ;;  %v3202_v53 = vld [vmem:[%s4410_s9 + $0x10c] ss:$12 sps:$4 sm:$0xff]  }
 0x332   :  { %v1103_v59 = vadd.f32 %v1102_v55, %v1101_v47  ;;  %v1124_v60 = vrot.slane %v1123_v56, 4  ;;  %1721 = vmatpush1.bf16.msra.mxu1 %v3176_v24  ;;  %v3197_v47 = vld [vmem:[%s4410_s9 + $0xf4] ss:$12 sps:$4 sm:$0xff]   ;;  %v3203_v54 = vld [vmem:[%s4410_s9 + $0x110] ss:$12 sps:$4 sm:$0xff]  }
 0x333   :  { %v1111_v61 = vadd.f32 %v1110_v57, %v1109_v51  ;;  %v1132_v62 = vrot.slane %v1131_v58, 4  ;;  %1722 = vmatprep.subr.bf16.mxu1 %v3181_v25  ;;  %v3199_v51 = vld [vmem:[%s4410_s9 + $0x38] ss:$12 sps:$4 sm:$0xff]   ;;  %v3200_v55 = vld [vmem:[%s4410_s9 + $0x108] ss:$12 sps:$4 sm:$0xff]  }
 0x334   :  { %v1104_v63 = vrot.slane %v1103_v59, 2  ;;  %v1125_v0 = vadd.f32 %v1124_v60, %v1123_v56  ;;  %v3204_v56 = vld [vmem:[%s4410_s9 + $0x50] ss:$12 sps:$4 sm:$0xff]   ;;  %v3209_v60 = vld [vmem:[%s4410_s9 + $0x68] ss:$12 sps:$4 sm:$0xff]  }
 0x335   :  { %v1112_v2 = vrot.slane %v1111_v61, 2  ;;  %v1133_v3 = vadd.f32 %v1132_v62, %v1131_v58  ;;  %v3207_v57 = vld [vmem:[%s4410_s9 + $0x124] ss:$12 sps:$4 sm:$0xff]   ;;  %v3208_v58 = vld [vmem:[%s4410_s9 + $0x128] ss:$12 sps:$4 sm:$0xff]  }
 0x336   :  { %v1105_v4 = vadd.f32 %v1104_v63, %v1103_v59  ;;  %v1126_v5 = vrot.slane %v1125_v0, 2  ;;  %1723 = vmatpush1.bf16.msra.mxu1 %v3179_v27  ;;  %v3205_v59 = vld [vmem:[%s4410_s9 + $0x120] ss:$12 sps:$4 sm:$0xff]   ;;  %v3210_v63 = vld [vmem:[%s4410_s9 + $0x138] ss:$12 sps:$4 sm:$0xff]  }
 0x337   :  { %v1113_v15 = vadd.f32 %v1112_v2, %v1111_v61  ;;  %v1134_v7 = vrot.slane %v1133_v3, 2  ;;  %1724 = vmatprep.subr.bf16.mxu1 %v3184_v30  ;;  %v3212_v61 = vld [vmem:[%s4410_s9 + $0x13c] ss:$12 sps:$4 sm:$0xff]   ;;  %v3213_v62 = vld [vmem:[%s4410_s9 + $0x140] ss:$12 sps:$4 sm:$0xff]  }
 0x338   :  { %v1127_v26 = vadd.f32 %v1126_v5, %v1125_v0  ;;  %v1106_v9 = vrot.slane %v1105_v4, 1  ;;  %v3214_v0 = vld [vmem:[%s4410_s9 + $0x80] ss:$12 sps:$4 sm:$0xff]   ;;  %v3215_v2 = vld [vmem:[%s4410_s9 + $0x150] ss:$12 sps:$4 sm:$0xff]  }
 0x339   :  { %v1114_v29 = vrot.slane %v1113_v15, 1  ;;  %v1135_v8 = vadd.f32 %v1134_v7, %v1133_v3  ;;  %v3217_v3 = vld [vmem:[%s4410_s9 + $0x154] ss:$12 sps:$4 sm:$0xff]   ;;  %v3219_v5 = vld [vmem:[%s4410_s9 + $0x98] ss:$12 sps:$4 sm:$0xff]  }
 0x33a   :  { %v1128_v10 = vrot.slane %v1127_v26, 1  ;;  %v1107_v16 = vadd.f32 %v1106_v9, %v1105_v4  ;;  %1725 = vmatpush1.bf16.msra.mxu1 %v3182_v31  ;;  %v3218_v4 = vld [vmem:[%s4410_s9 + $0x158] ss:$12 sps:$4 sm:$0xff]   ;;  %v3223_v7 = vld [vmem:[%s4410_s9 + $0x170] ss:$12 sps:$4 sm:$0xff]   ;;  %v1320_v31 = vsub.s32 1, %v3637_v43 }
 0x33b   :  { %v1136_v11 = vrot.slane %v1135_v8, 1  ;;  %v1115_v13 = vadd.f32 %v1114_v29, %v1113_v15  ;;  %1726 = vmatprep.subr.bf16.mxu1 %v3187_v32  ;;  %v3222_v15 = vld [vmem:[%s4410_s9 + $0x16c] ss:$12 sps:$4 sm:$0xff]   ;;  %v3224_v29 = vld [vmem:[%s4410_s9 + $0xb0] ss:$12 sps:$4 sm:$0xff]  }
 0x33c   :  { %v1129_v12 = vadd.f32 %v1128_v10, %v1127_v26  ;;  %v3220_v26 = vld [vmem:[%s4410_s9 + $0x168] ss:$12 sps:$4 sm:$0xff]   ;;  %v1287_v27 = vld [vmem:[%s4411_s7] sm:$0x3] }
 0x33d   :  { %v1137_v14 = vadd.f32 %v1136_v11, %v1135_v8 }
 0x33e   :  { %v1138_v18 = vsel %vm397_vm4, %v1107_v16, %v1129_v12  ;;  %1727 = vmatpush1.bf16.msra.mxu1 %v3185_v38 }
 0x33f   :  { %v1139_v17 = vsel %vm397_vm4, %v1115_v13, %v1137_v14  ;;  %1728 = vmatprep.subr.bf16.mxu1 %v3192_v40 }
 0x340   :  { %1268 = vmatprep.mubr.f32.mxu0 %v1139_v17 }
 0x341   :  { %1269 = vmatmul.mubr.f32.vlgmr.msra.gmra.mrb[10].mxu0 %v1138_v18 }
 0x342   :  { %2700 = vmatpush3.bf16.msra.mxu0 %v3189_v39  ;;  %1729 = vmatpush1.bf16.msra.mxu1 %v3190_v45 }
 0x343   :  { %2701 = vmatprep.subr.bf16.mxu0 %v3193_v42  ;;  %1730 = vmatprep.subr.bf16.mxu1 %v3197_v47 }
 0x346   :  { %2702 = vmatpush3.bf16.msra.mxu0 %v3194_v46  ;;  %1731 = vmatpush1.bf16.msra.mxu1 %v3195_v49  ;;  %v1312_v46 = vld [vmem:[%s4412_s8] sm:$0x3] }
 0x347   :  { %2703 = vmatprep.subr.bf16.mxu0 %v3198_v48  ;;  %1732 = vmatprep.subr.bf16.mxu1 %v3202_v53 }
 0x34a   :  { %2704 = vmatpush3.bf16.msra.mxu0 %v3199_v51  ;;  %1733 = vmatpush1.bf16.msra.mxu1 %v3200_v55 }
 0x34b   :  { %2705 = vmatprep.subr.bf16.mxu0 %v3203_v54  ;;  %1734 = vmatprep.subr.bf16.mxu1 %v3207_v57 }
 0x34e   :  { %2706 = vmatpush3.bf16.msra.mxu0 %v3204_v56  ;;  %1735 = vmatpush1.bf16.msra.mxu1 %v3205_v59 }
 0x34f   :  { %2707 = vmatprep.subr.bf16.mxu0 %v3208_v58  ;;  %1736 = vmatprep.subr.bf16.mxu1 %v3212_v61 }
 0x352   :  { %2708 = vmatpush3.bf16.msra.mxu0 %v3209_v60  ;;  %1737 = vmatpush1.bf16.msra.mxu1 %v3210_v63 }
 0x353   :  { %2709 = vmatprep.subr.bf16.mxu0 %v3213_v62  ;;  %1738 = vmatprep.subr.bf16.mxu1 %v3217_v3 }
 0x356   :  { %2710 = vmatpush3.bf16.msra.mxu0 %v3214_v0  ;;  %1739 = vmatpush1.bf16.msra.mxu1 %v3215_v2 }
 0x357   :  { %2711 = vmatprep.subr.bf16.mxu0 %v3218_v4  ;;  %1740 = vmatprep.subr.bf16.mxu1 %v3222_v15 }
 0x35a   :  { %2712 = vmatpush3.bf16.msra.mxu0 %v3219_v5  ;;  %1741 = vmatpush1.bf16.msra.mxu1 %v3220_v26 }
 0x35b   :  { %2713 = vmatprep.subr.bf16.mxu0 %v3223_v7  ;;  %3004 = vmatprep.subr.bf16.mxu1 %v3268_v34 }
 0x35e   :  { %2714 = vmatpush3.bf16.msra.mxu0 %v3224_v29 }
 0x414   :  { %v1270_v8 = vpop.f32.mrb[10].mxu0 }
 0x415   :  { %v1275_v9 = vmul.f32 %v1270_v8, %v1270_v8  ;;  %v1272_v10 = vpop.f32.mrb[11].mxu0 }
 0x416   :  { %v1276_v11 = vmul.f32 %v1272_v10, %v1272_v10 }
 0x417   :  { %v1279_v12 = vrot.slane %v1275_v9, 7  ;;  %v1894_v9 = vld [vmem:[%s4413_s10] sm:$0xff] }
 0x418   :  { %v1280_v13 = vrot.slane %v1276_v11, 7 }
 0x419   :  { %v1283_v14 = vsub.f32 %v1270_v8, %v1279_v12  ;;  %v1896_v12 = vld [vmem:[%s4413_s10 + $0x10] sm:$0xff] }
 0x41a   :  { %v1284_v16 = vsub.f32 %v1272_v10, %v1280_v13  ;;  %v1897_v13 = vld [vmem:[%s4413_s10 + $0x18] sm:$0xff] }
 0x41b   :  { %v1285_v17 = vmax.f32 %v1283_v14, 0.0  ;;  %v3008_v14 = vpack.c.bf16 %v1897_v13, %v1896_v12 }
 0x41c   :  { %v1286_v18 = vmax.f32 %v1284_v16, 0.0  ;;  %v1898_v16 = vld [vmem:[%s4413_s10 + $0x20] sm:$0xff] }
 0x41d   :  { %v1288_v19 = vadd.f32 1e-05, %v1285_v17  ;;  %v1899_v17 = vld [vmem:[%s4413_s10 + $0x28] sm:$0xff] }
 0x41e   :  { %v1289_v20 = vadd.f32 1e-05, %v1286_v18  ;;  %v3011_v18 = vpack.c.bf16 %v1899_v17, %v1898_v16 }
 0x41f   :  { %3259 = vrsqrt.f32 %v1288_v19  ;;  %v1900_v19 = vld [vmem:[%s4413_s10 + $0x30] sm:$0xff] }
 0x420   :  { %3261 = vrsqrt.f32 %v1289_v20  ;;  %v1901_v20 = vld [vmem:[%s4413_s10 + $0x38] sm:$0xff] }
 0x429   :  { %v3260_v21 = vpop.eup %3259 }
 0x42a   :  { %v3262_v22 = vpop.eup %3261 }
 0x42b   :  { %v1294_v23 = vcombine.low %v3260_v21, %v3262_v22  ;;  %v3014_v21 = vpack.c.bf16 %v1901_v20, %v1900_v19  ;;  %v1902_v22 = vld [vmem:[%s4413_s10 + $0x40] sm:$0xff] }
 0x42d   :  { %v1301_v24 = vrot.slane %v1294_v23, %v3640_v44  ;;  %v1903_v23 = vld [vmem:[%s4413_s10 + $0x48] sm:$0xff] }
 0x42f   :  { %v1302_v25 = vcombine.high %v1301_v24, %v1301_v24  ;;  %v3017_v24 = vpack.c.bf16 %v1903_v23, %v1902_v22 }
 0x431   :  { %v1309_v30 = vrot.slane %v1302_v25, %v3640_v44  ;;  %v1904_v25 = vld [vmem:[%s4413_s10 + $0x50] sm:$0xff] }
 0x433   :  { %v1311_v32 = vmul.f32 %v1309_v30, %v1287_v27  ;;  %v1905_v27 = vld [vmem:[%s4413_s10 + $0x58] sm:$0xff] }
 0x434   :  { %v3020_v30 = vpack.c.bf16 %v1905_v27, %v1904_v25 }
 0x435   :  { %v1317_v36 = vrot.slane %v1311_v32, %v3648_v50  ;;  %v1321_v38 = vrot.slane %v1311_v32, %v1320_v31  ;;  %v1907_v32 = vld [vmem:[%s4413_s10 + $0x68] sm:$0xff] }
 0x437   :  { %v1324_v39 = vmul.f32 %v1317_v36, %v1270_v8  ;;  %v1325_v40 = vmul.f32 %v1321_v38, %v1272_v10  ;;  %v1346_v49 = vmul.f32 %v1321_v38, %v3928_v28  ;;  %v1348_v43 = vmul.f32 %v1321_v38, %v3950_v41  ;;  %v1895_v10 = vld [vmem:[%s4413_s10 + $0x8] sm:$0xff] }
 0x438   :  { %v1345_v54 = vmul.f32 %v1317_v36, %v3925_v6  ;;  %v1347_v55 = vmul.f32 %v1317_v36, %v3937_v35  ;;  %v1350_v56 = vmul.f32 %v1321_v38, %v3941_v37  ;;  %v1349_v57 = vmul.f32 %v1317_v36, %v3934_v33  ;;  %v1908_v38 = vld [vmem:[%s4413_s10 + $0x70] sm:$0xff] }
 0x439   :  { %v1328_v42 = vcombine.low %v1324_v39, %v1325_v40  ;;  %v3005_v11 = vpack.c.bf16 %v1895_v10, %v1894_v9  ;;  %v1909_v39 = vld [vmem:[%s4413_s10 + $0x78] sm:$0xff] }
 0x43a   :  { %v3026_v40 = vpack.c.bf16 %v1909_v39, %v1908_v38 }
 0x43b   :  { %v1335_v45 = vrot.slane %v1328_v42, %v3640_v44 }
 0x43d   :  { %v1342_v47 = vrot.slane %v1335_v45, %v3640_v44 }
 0x43f   :  { %v1344_v48 = vsub.f32 %v1312_v46, %v1342_v47 }
 0x441   :  { %v1355_v51 = vrot.slane %v1344_v48, %v3648_v50  ;;  %v1359_v53 = vrot.slane %v1344_v48, %v1320_v31  ;;  %v1906_v31 = vld [vmem:[%s4413_s10 + $0x60] sm:$0xff] }
 0x442   :  { %v3023_v36 = vpack.c.bf16 %v1907_v32, %v1906_v31 }
 0x443   :  { %v1363_v58 = vadd.f32 %v1359_v53, %v1346_v49  ;;  %v1365_v59 = vadd.f32 %v1359_v53, %v1348_v43  ;;  %v1362_v60 = vadd.f32 %v1355_v51, %v1345_v54  ;;  %v1364_v61 = vadd.f32 %v1355_v51, %v1347_v55 }
 0x444   :  { %v1367_v62 = vadd.f32 %v1359_v53, %v1350_v56  ;;  %v1366_v63 = vadd.f32 %v1355_v51, %v1349_v57 }
 0x445   :  { %vm1369_vm9 = vcmp.gt.f32.partialorder %v1363_v58, 0.0  ;;  %vm1371_vm10 = vcmp.gt.f32.partialorder %v1365_v59, 0.0  ;;  %v1375_v28 = vmul.f32 0.01, %v1363_v58  ;;  %v1377_v41 = vmul.f32 0.01, %v1365_v59 }
 0x446   :  { %vm1368_vm11 = vcmp.gt.f32.partialorder %v1362_v60, 0.0  ;;  %vm1370_vm12 = vcmp.gt.f32.partialorder %v1364_v61, 0.0  ;;  %v1374_v0 = vmul.f32 0.01, %v1362_v60  ;;  %v1376_v6 = vmul.f32 0.01, %v1364_v61 }
 0x447   :  { %v1381_v2 = vsel %vm1369_vm9, %v1363_v58, %v1375_v28  ;;  %v1383_v35 = vsel %vm1371_vm10, %v1365_v59, %v1377_v41  ;;  %vm1373_vm13 = vcmp.gt.f32.partialorder %v1367_v62, 0.0  ;;  %v1379_v37 = vmul.f32 0.01, %v1367_v62 }
 0x448   :  { %v1387_v3 = vpack.c.bf16 %v1383_v35, %v1381_v2  ;;  %v1380_v33 = vsel %vm1368_vm11, %v1362_v60, %v1374_v0  ;;  %v1382_v4 = vsel %vm1370_vm12, %v1364_v61, %v1376_v6  ;;  %v1378_v26 = vmul.f32 0.01, %v1366_v63 }
 0x449   :  { %v1386_v5 = vpack.c.bf16 %v1382_v4, %v1380_v33  ;;  %v1385_v15 = vsel %vm1373_vm13, %v1367_v62, %v1379_v37  ;;  %vm1372_vm14 = vcmp.gt.f32.partialorder %v1366_v63, 0.0 }
 0x44a   :  { %1742 = vmatprep.mubr.bf16.mxu1 %v1387_v3  ;;  %1793 = vmatprep.mubr.bf16.mxu0 %v1387_v3  ;;  %v1389_v7 = vpack.c.bf16 %v1385_v15, %v1385_v15  ;;  %v1384_v29 = vsel %vm1372_vm14, %v1366_v63, %v1378_v26 }
 0x44b   :  { %1743 = vmatmul.mubr.bf16.vlgmr.msra.gmra.mrb[20].mxu1 %v1386_v5  ;;  %1794 = vmatmul.mubr.bf16.vlgmr.msra.gmra.mrb[20].mxu0 %v1386_v5  ;;  %v1388_v8 = vpack.c.bf16 %v1384_v29, %v1384_v29 }
 0x44c   :  { %1752 = vmatprep.mubr.bf16.mxu1 %v1389_v7  ;;  %1801 = vmatprep.mubr.bf16.mxu0 %v1389_v7 }
 0x44d   :  { %3006 = vmatpush3.bf16.msra.mxu1 %v3005_v11 }
 0x44e   :  { %3007 = vmatprep.subr.bf16.mxu1 %v3268_v34 }
 0x451   :  { %3009 = vmatpush3.bf16.msra.mxu1 %v3008_v14 }
 0x452   :  { %3010 = vmatprep.subr.bf16.mxu1 %v3268_v34 }
 0x453   :  { %1753 = vmatmul.mubr.bf16.gmra.mrb[24].mxu1 %v1388_v8  ;;  %1802 = vmatmul.mubr.bf16.gmra.mrb[24].mxu0 %v1388_v8 }
 0x454   :  { %2858 = vmatprep.mubr.msk.f32.mxu1 %vm3269_vm0, %v3270_v52  ;;  %2228 = vmatprep.mubr.bf16.mxu0 %v3267_v1 }
 0x455   :  { %3012 = vmatpush3.bf16.msra.mxu1 %v3011_v18 }
 0x456   :  { %3013 = vmatprep.subr.bf16.mxu1 %v3268_v34 }
 0x459   :  { %3015 = vmatpush3.bf16.msra.mxu1 %v3014_v21 }
 0x45a   :  { %3016 = vmatprep.subr.bf16.mxu1 %v3268_v34 }
 0x45d   :  { %3018 = vmatpush3.bf16.msra.mxu1 %v3017_v24 }
 0x45e   :  { %3019 = vmatprep.subr.bf16.mxu1 %v3268_v34 }
 0x461   :  { %3021 = vmatpush3.bf16.msra.mxu1 %v3020_v30 }
 0x462   :  { %3022 = vmatprep.subr.bf16.mxu1 %v3268_v34 }
 0x465   :  { %3024 = vmatpush3.bf16.msra.mxu1 %v3023_v36 }
 0x466   :  { %3025 = vmatprep.subr.bf16.mxu1 %v3268_v34 }
 0x469   :  { %3027 = vmatpush3.bf16.msra.mxu1 %v3026_v40 }
 0x51e   :  { %v1744_v42 = vpop.f32.mrb[20].mxu1  ;;  %v2715_v45 = vpop.f32.mrb[20].mxu0 }
 0x51f   :  { %v1746_v46 = vpop.f32.mrb[21].mxu1  ;;  %v2716_v47 = vpop.f32.mrb[21].mxu0 }
 0x520   :  { %v1812_v48 = vrot.slane %v1746_v46, 7  ;;  %v2717_v49 = vadd.f32 %v2716_v47, %v2715_v45  ;;  %v1748_v43 = vpop.f32.mrb[22].mxu1  ;;  %v2718_v51 = vpop.f32.mrb[22].mxu0 }
 0x521   :  { %v1750_v53 = vpop.f32.mrb[23].mxu1  ;;  %v2719_v54 = vpop.f32.mrb[23].mxu0  ;;  %v1809_v63 = vsel %vm374_vm3, %v1748_v43, 0.0  ;;  %v1835_v35 = vrot.slane %v1748_v43, 4 }
 0x522   :  { %v1817_v55 = vsel %vm397_vm4, 0.0, %v1812_v48  ;;  %v1825_v56 = vrot.slane %v2717_v49, 6  ;;  %v1813_v57 = vrot.slane %v1750_v53, 7  ;;  %v2720_v59 = vadd.f32 %v2719_v54, %v2718_v51 }
 0x523   :  { %v1820_v58 = vadd.f32 %v1817_v55, %v1744_v42  ;;  %v1842_v5 = vrot.slane %v1750_v53, 3 }
 0x524   :  { %v1830_v60 = vsel %vm1824_vm15, 0.0, %v1825_v56  ;;  %v1814_v61 = vsel %vm397_vm4, %v1812_v48, %v1813_v57  ;;  %v1826_v28 = vrot.slane %v2720_v59, 6  ;;  %v1852_v13 = vrot.slane %v2720_v59, 2 }
 0x525   :  { %v4173_v62 = vadd.f32 %v1830_v60, %v1820_v58  ;;  %v1819_v41 = vsel %vm1818_vm5, %v1814_v61, 0.0 }
 0x526   :  { %v1754_v0 = vpop.f32.mrb[24].mxu1  ;;  %v2721_v6 = vpop.f32.mrb[24].mxu0  ;;  %v1821_v2 = vadd.f32 %v1819_v41, %v1809_v63  ;;  %v1827_v37 = vsel %vm1824_vm15, %v1825_v56, %v1826_v28 }
 0x527   :  { %v1836_v3 = vrot.slane %v1754_v0, 4  ;;  %v1756_v33 = vpop.f32.mrb[25].mxu1  ;;  %v2722_v4 = vpop.f32.mrb[25].mxu0  ;;  %v1879_v32 = vmul.f32 %v4173_v62, %v4173_v62  ;;  %v3227_v0 = vld [vmem:[%s4414_s13 + $0x4] ss:$12 sps:$4 sm:$0xff]  }
 0x528   :  { %v1832_v15 = vadd.f32 %v1827_v37, %v1821_v2  ;;  %v1843_v7 = vrot.slane %v1756_v33, 3  ;;  %v2723_v26 = vadd.f32 %v2722_v4, %v2721_v6  ;;  %v1758_v29 = vpop.f32.mrb[26].mxu1  ;;  %v2724_v8 = vpop.f32.mrb[26].mxu0  ;;  %v3225_v6 = vld [vmem:[%s4414_s13] ss:$12 sps:$4 sm:$0xff]   ;;  %2196 = vmatprep.subr.bf16.mxu0 %v3227_v0 }
 0x529   :  { %v1837_v9 = vsel %vm374_vm3, %v1835_v35, %v1836_v3  ;;  %v1840_v10 = vsel %vm374_vm3, %v1836_v3, 0.0  ;;  %v1759_v11 = vpop.f32.mrb[27].mxu1  ;;  %v2725_v12 = vpop.f32.mrb[27].mxu0  ;;  %v3228_v2 = vld [vmem:[%s4414_s13 + $0x8] ss:$12 sps:$4 sm:$0xff]   ;;  %2197 = vmatpush1.bf16.msra.mxu0 %v3225_v6  ;;  %v2384_v6 = vld [vmem:[%s4417_s14 + $0x20] sm:$0xff] }
 0x52a   :  { %v1844_v14 = vsel %vm1818_vm5, %v1842_v5, %v1843_v7  ;;  %v1848_v16 = vsel %vm1818_vm5, %v1843_v7, 0.0  ;;  %v1853_v17 = vrot.slane %v2723_v26, 2  ;;  %2861 = vmatprep.subr.bf16.mxu1 %v3228_v2  ;;  %v3231_v35 = vld [vmem:[%s4414_s13 + $0x1c] ss:$12 sps:$4 sm:$0xff]   ;;  %v3229_v37 = vld [vmem:[%s4414_s13 + $0x18] ss:$12 sps:$4 sm:$0xff]  }
 0x52b   :  { %v1847_v18 = vsel %vm397_vm4, 0.0, %v1844_v14  ;;  %v1850_v19 = vadd.f32 %v1848_v16, %v1840_v10  ;;  %v3232_v3 = vld [vmem:[%s4414_s13 + $0x20] ss:$12 sps:$4 sm:$0xff]   ;;  %2198 = vmatprep.subr.bf16.mxu0 %v3231_v35  ;;  %v3233_v4 = vld [vmem:[%s4414_s13 + $0x30] ss:$12 sps:$4 sm:$0xff]  }
 0x52c   :  { %v1849_v20 = vadd.f32 %v1847_v18, %v1837_v9  ;;  %v1854_v21 = vsel %vm337_vm2, %v1852_v13, %v1853_v17  ;;  %v3235_v33 = vld [vmem:[%s4414_s13 + $0x34] ss:$12 sps:$4 sm:$0xff]   ;;  %v3236_v5 = vld [vmem:[%s4414_s13 + $0x38] ss:$12 sps:$4 sm:$0xff]   ;;  %v3240_v26 = vld [vmem:[%s4414_s13 + $0x50] ss:$12 sps:$4 sm:$0xff]  }
 0x52d   :  { %v1857_v22 = vsel %vm1824_vm15, 0.0, %v1854_v21  ;;  %v1859_v23 = vadd.f32 %v1853_v17, %v1850_v19  ;;  %2199 = vmatpush1.bf16.msra.mxu0 %v3229_v37  ;;  %v3237_v7 = vld [vmem:[%s4414_s13 + $0x48] ss:$12 sps:$4 sm:$0xff]   ;;  %v3243_v29 = vld [vmem:[%s4414_s13 + $0x64] ss:$12 sps:$4 sm:$0xff]  }
 0x52e   :  { %v1858_v24 = vadd.f32 %v1857_v22, %v1849_v20  ;;  %2200 = vmatprep.subr.bf16.mxu0 %v3235_v33  ;;  %v3241_v8 = vld [vmem:[%s4414_s13 + $0x60] ss:$12 sps:$4 sm:$0xff]   ;;  %v3244_v9 = vld [vmem:[%s4414_s13 + $0x68] ss:$12 sps:$4 sm:$0xff]   ;;  %v3245_v11 = vld [vmem:[%s4414_s13 + $0x78] ss:$12 sps:$4 sm:$0xff]  }
 0x52f   :  { %v4185_v25 = vrot.slane %v1859_v23, 2  ;;  %v3247_v10 = vld [vmem:[%s4414_s13 + $0x7c] ss:$12 sps:$4 sm:$0xff]   ;;  %v3248_v12 = vld [vmem:[%s4414_s13 + $0x80] ss:$12 sps:$4 sm:$0xff]   ;;  %v2386_v37 = vld [vmem:[%s4417_s14 + $0x30] sm:$0xff] }
 0x530   :  { %v1862_v27 = vrot.slane %v1858_v24, 2  ;;  %v3251_v13 = vld [vmem:[%s4414_s13 + $0x94] ss:$12 sps:$4 sm:$0xff]   ;;  %v3252_v14 = vld [vmem:[%s4414_s13 + $0x98] ss:$12 sps:$4 sm:$0xff]  }
 0x531   :  { %v1882_v39 = vmul.f32 %v4185_v25, %v4185_v25  ;;  %v1871_v46 = vsel %vm374_vm3, %v4185_v25, 0.0  ;;  %2201 = vmatpush1.bf16.msra.mxu0 %v3233_v4  ;;  %v3249_v16 = vld [vmem:[%s4414_s13 + $0x90] ss:$12 sps:$4 sm:$0xff]   ;;  %v3255_v17 = vld [vmem:[%s4414_s13 + $0xac] ss:$12 sps:$4 sm:$0xff]   ;;  %v2388_v4 = vld [vmem:[%s4417_s14 + $0x40] sm:$0xff] }
 0x532   :  { %v4189_v30 = vsel %vm337_vm2, %v1862_v27, %v4185_v25  ;;  %v4192_v31 = vsel %vm337_vm2, %v1832_v15, %v1862_v27  ;;  %v3239_v15 = vld [vmem:[%s4414_s13 + $0x4c] ss:$12 sps:$4 sm:$0xff]   ;;  %v3256_v18 = vld [vmem:[%s4414_s13 + $0xb0] ss:$12 sps:$4 sm:$0xff]   ;;  %v3253_v19 = vld [vmem:[%s4414_s13 + $0xa8] ss:$12 sps:$4 sm:$0xff]  }
 0x533   :  { %v1869_v36 = vadd.f32 %v4192_v31, %v4173_v62  ;;  %v1880_v38 = vmul.f32 %v4192_v31, %v4192_v31  ;;  %v1881_v42 = vmul.f32 %v4189_v30, %v4189_v30  ;;  %v1885_v49 = vsel %vm374_vm3, %v1882_v39, 0.0  ;;  %2202 = vmatprep.subr.bf16.mxu0 %v3239_v15 }
 0x535   :  { %v1870_v40 = vadd.f32 %v1869_v36, %v4189_v30  ;;  %v1883_v45 = vadd.f32 %v1880_v38, %v1879_v32  ;;  %2203 = vmatpush1.bf16.msra.mxu0 %v3237_v7  ;;  %v2390_v7 = vld [vmem:[%s4417_s14 + $0x50] sm:$0xff] }
 0x536   :  { %2204 = vmatprep.subr.bf16.mxu0 %v3243_v29 }
 0x537   :  { %v1872_v47 = vadd.f32 %v1871_v46, %v1870_v40  ;;  %v1884_v48 = vadd.f32 %v1883_v45, %v1881_v42  ;;  %v1986_v40 = vld [vmem:[%s4415_s11] sm:$0x1] }
 0x538   :  { %v2007_v46 = vld [vmem:[%s4416_s12] sm:$0x1] }
 0x539   :  { %v1873_v43 = vrot.slane %v1872_v47, 4  ;;  %v1886_v51 = vadd.f32 %v1885_v49, %v1884_v48  ;;  %2205 = vmatpush1.bf16.msra.mxu0 %v3241_v8  ;;  %v2392_v8 = vld [vmem:[%s4417_s14 + $0x60] sm:$0xff] }
 0x53a   :  { %2206 = vmatprep.subr.bf16.mxu0 %v3247_v10 }
 0x53b   :  { %v1874_v53 = vadd.f32 %v1873_v43, %v1872_v47  ;;  %v1887_v54 = vrot.slane %v1886_v51, 4 }
 0x53d   :  { %v1875_v55 = vrot.slane %v1874_v53, 2  ;;  %v1888_v56 = vadd.f32 %v1887_v54, %v1886_v51  ;;  %2207 = vmatpush1.bf16.msra.mxu0 %v3245_v11  ;;  %v2394_v11 = vld [vmem:[%s4417_s14 + $0x70] sm:$0xff] }
 0x53e   :  { %2208 = vmatprep.subr.bf16.mxu0 %v3251_v13 }
 0x53f   :  { %v1876_v57 = vadd.f32 %v1875_v55, %v1874_v53  ;;  %v1889_v58 = vrot.slane %v1888_v56, 2 }
 0x541   :  { %v1877_v59 = vrot.slane %v1876_v57, 1  ;;  %v1890_v60 = vadd.f32 %v1889_v58, %v1888_v56  ;;  %2209 = vmatpush1.bf16.msra.mxu0 %v3249_v16 }
 0x542   :  { %2210 = vmatprep.subr.bf16.mxu0 %v3255_v17 }
 0x543   :  { %v1891_v61 = vrot.slane %v1890_v60, 1  ;;  %v1878_v63 = vadd.f32 %v1877_v59, %v1876_v57 }
 0x545   :  { %v1892_v28 = vadd.f32 %v1891_v61, %v1890_v60  ;;  %2211 = vmatpush1.bf16.msra.mxu0 %v3253_v19 }
 0x546   :  { %3028 = vmatprep.subr.bf16.mxu0 %v3268_v34 }
 0x547   :  { %v1893_v41 = vsel %vm397_vm4, %v1878_v63, %v1892_v28 }
 0x548   :  { %2859 = vmatmul.mubr.f32.vlgmr.msra.gmra.mrb[28].mxu1 %v1893_v41 }
 0x549   :  { %2862 = vmatpush3.bf16.msra.mxu1 %v3228_v2  ;;  %v2385_v2 = vld [vmem:[%s4417_s14 + $0x28] sm:$0xff] }
 0x54a   :  { %2863 = vmatprep.subr.bf16.mxu1 %v3232_v3  ;;  %v3035_v35 = vpack.c.bf16 %v2385_v2, %v2384_v6 }
 0x54d   :  { %2864 = vmatpush3.bf16.msra.mxu1 %v3232_v3  ;;  %v2387_v3 = vld [vmem:[%s4417_s14 + $0x38] sm:$0xff] }
 0x54e   :  { %2865 = vmatprep.subr.bf16.mxu1 %v3236_v5  ;;  %v3038_v33 = vpack.c.bf16 %v2387_v3, %v2386_v37 }
 0x551   :  { %2866 = vmatpush3.bf16.msra.mxu1 %v3236_v5  ;;  %v2389_v5 = vld [vmem:[%s4417_s14 + $0x48] sm:$0xff] }
 0x552   :  { %2867 = vmatprep.subr.bf16.mxu1 %v3240_v26  ;;  %v3041_v15 = vpack.c.bf16 %v2389_v5, %v2388_v4 }
 0x555   :  { %2868 = vmatpush3.bf16.msra.mxu1 %v3240_v26  ;;  %v2391_v26 = vld [vmem:[%s4417_s14 + $0x58] sm:$0xff] }
 0x556   :  { %2869 = vmatprep.subr.bf16.mxu1 %v3244_v9  ;;  %v3044_v29 = vpack.c.bf16 %v2391_v26, %v2390_v7 }
 0x559   :  { %2870 = vmatpush3.bf16.msra.mxu1 %v3244_v9  ;;  %v2393_v9 = vld [vmem:[%s4417_s14 + $0x68] sm:$0xff] }
 0x55a   :  { %2871 = vmatprep.subr.bf16.mxu1 %v3248_v12  ;;  %v3047_v10 = vpack.c.bf16 %v2393_v9, %v2392_v8 }
 0x55d   :  { %2872 = vmatpush3.bf16.msra.mxu1 %v3248_v12  ;;  %v2395_v12 = vld [vmem:[%s4417_s14 + $0x78] sm:$0xff] }
 0x55e   :  { %2873 = vmatprep.subr.bf16.mxu1 %v3252_v14  ;;  %v3050_v13 = vpack.c.bf16 %v2395_v12, %v2394_v11 }
 0x561   :  { %2874 = vmatpush3.bf16.msra.mxu1 %v3252_v14 }
 0x562   :  { %2875 = vmatprep.subr.bf16.mxu1 %v3256_v18 }
 0x565   :  { %2876 = vmatpush3.bf16.msra.mxu1 %v3256_v18 }
 0x61b   :  { %v1976_v20 = vpop.f32.mrb[28].mxu1 }
 0x61c   :  { %v1980_v21 = vmul.f32 %v1976_v20, %v1976_v20  ;;  %v2860_v22 = vpop.f32.mrb[29].mxu1 }
 0x61e   :  { %v1982_v23 = vrot.slane %v1980_v21, 7 }
 0x620   :  { %v1984_v24 = vsub.f32 %v1976_v20, %v1982_v23 }
 0x622   :  { %v1985_v27 = vmax.f32 %v1984_v24, 0.0 }
 0x624   :  { %v1987_v32 = vadd.f32 1e-05, %v1985_v27 }
 0x626   :  { %3263 = vrsqrt.f32 %v1987_v32 }
 0x630   :  { %v3264_v36 = vpop.eup %3263 }
 0x631   :  { %v1996_v38 = vrot.slane %v3264_v36, %v3640_v44 }
 0x633   :  { %v1997_v39 = vcombine.high %v1996_v38, %v1996_v38 }
 0x635   :  { %v2004_v42 = vrot.slane %v1997_v39, %v3640_v44 }
 0x637   :  { %v2006_v45 = vmul.f32 %v2004_v42, %v1986_v40 }
 0x639   :  { %v2008_v47 = vmul.f32 %v2006_v45, %v1976_v20  ;;  %v2014_v48 = vrot.slane %v2006_v45, %v3648_v50 }
 0x63b   :  { %v2009_v49 = vsub.f32 %v2007_v46, %v2008_v47  ;;  %v2016_v43 = vmul.f32 %v2014_v48, %v4173_v62  ;;  %v2017_v51 = vmul.f32 %v2014_v48, %v4192_v31  ;;  %v2018_v54 = vmul.f32 %v2014_v48, %v4189_v30  ;;  %v2380_v62 = vld [vmem:[%s4417_s14] sm:$0xff] }
 0x63c   :  { %v2019_v55 = vmul.f32 %v2014_v48, %v4185_v25  ;;  %v2381_v25 = vld [vmem:[%s4417_s14 + $0x8] sm:$0xff] }
 0x63d   :  { %v2024_v53 = vrot.slane %v2009_v49, %v3648_v50  ;;  %v3029_v30 = vpack.c.bf16 %v2381_v25, %v2380_v62 }
 0x63f   :  { %v2026_v56 = vadd.f32 %v2024_v53, %v2016_v43  ;;  %v2027_v57 = vadd.f32 %v2024_v53, %v2017_v51  ;;  %v2028_v58 = vadd.f32 %v2024_v53, %v2018_v54  ;;  %v2029_v59 = vadd.f32 %v2024_v53, %v2019_v55 }
 0x641   :  { %v2030_v60 = vmax.f32 %v2026_v56, 0.0  ;;  %v2031_v61 = vmax.f32 %v2027_v57, 0.0  ;;  %v2032_v63 = vmax.f32 %v2028_v58, 0.0  ;;  %v2033_v28 = vmax.f32 %v2029_v59, 0.0 }
 0x643   :  { %v2034_v41 = vpack.c.bf16 %v2031_v61, %v2030_v60  ;;  %v2035_v0 = vpack.c.bf16 %v2033_v28, %v2032_v63 }
 0x645   :  { %2229 = vmatmul.mubr.bf16.vlgmr.msra.gmra.mrb[28].mxu0 %v2034_v41  ;;  %2877 = vmatprep.mubr.bf16.mxu1 %v2034_v41 }
 0x646   :  { %2878 = vmatmul.mubr.bf16.vlgmr.msra.gmra.mrb[32].mxu1 %v2035_v0  ;;  %2238 = vmatprep.mubr.bf16.mxu0 %v3267_v1  ;;  %v2382_v1 = vld [vmem:[%s4417_s14 + $0x10] sm:$0xff] }
 0x647   :  { %3030 = vmatpush3.bf16.msra.mxu0 %v3029_v30 }
 0x648   :  { %3031 = vmatprep.subr.bf16.mxu0 %v3268_v34 }
 0x64d   :  { %2239 = vmatmul.mubr.bf16.gmra.mrb[32].mxu0 %v2035_v0 }
 0x64e   :  { %2913 = vmatprep.mubr.msk.f32.mxu0 %vm3269_vm0, %v3270_v52  ;;  %v2383_v52 = vld [vmem:[%s4417_s14 + $0x18] sm:$0xff]  ;;  %vm2333_vm0 = vcmask 1042432  }
 0x64f   :  { %v3032_v31 = vpack.c.bf16 %v2383_v52, %v2382_v1 }
 0x651   :  { %3033 = vmatpush3.bf16.msra.mxu0 %v3032_v31 }
 0x652   :  { %3034 = vmatprep.subr.bf16.mxu0 %v3268_v34 }
 0x655   :  { %3036 = vmatpush3.bf16.msra.mxu0 %v3035_v35 }
 0x656   :  { %3037 = vmatprep.subr.bf16.mxu0 %v3268_v34 }
 0x659   :  { %3039 = vmatpush3.bf16.msra.mxu0 %v3038_v33 }
 0x65a   :  { %3040 = vmatprep.subr.bf16.mxu0 %v3268_v34 }
 0x65d   :  { %3042 = vmatpush3.bf16.msra.mxu0 %v3041_v15 }
 0x65e   :  { %3043 = vmatprep.subr.bf16.mxu0 %v3268_v34 }
 0x661   :  { %3045 = vmatpush3.bf16.msra.mxu0 %v3044_v29 }
 0x662   :  { %3046 = vmatprep.subr.bf16.mxu0 %v3268_v34 }
 0x665   :  { %3048 = vmatpush3.bf16.msra.mxu0 %v3047_v10 }
 0x666   :  { %3049 = vmatprep.subr.bf16.mxu0 %v3268_v34 }
 0x669   :  { %3051 = vmatpush3.bf16.msra.mxu0 %v3050_v13 }
 0x718   :  { %v2230_v14 = vpop.f32.mrb[28].mxu0 }
 0x719   :  { %v2232_v16 = vpop.f32.mrb[29].mxu0  ;;  %v2879_v17 = vpop.f32.mrb[32].mxu1 }
 0x71a   :  { %v2301_v18 = vrot.slane %v2232_v16, 7  ;;  %v2234_v19 = vpop.f32.mrb[30].mxu0  ;;  %v2283_v20 = vpop.f32.mrb[33].mxu1  ;;  %v2348_v27 = vrot.slane %v2879_v17, 4 }
 0x71b   :  { %v2312_v21 = vrot.slane %v2283_v20, 6  ;;  %v2236_v22 = vpop.f32.mrb[31].mxu0  ;;  %v2880_v23 = vpop.f32.mrb[34].mxu1  ;;  %v2298_v45 = vsel %vm337_vm2, %v2234_v19, 0.0  ;;  %v2323_v55 = vrot.slane %v2234_v19, 6 }
 0x71c   :  { %v2306_v24 = vsel %vm397_vm4, 0.0, %v2301_v18  ;;  %v2302_v32 = vrot.slane %v2236_v22, 7  ;;  %v2350_v36 = vrot.slane %v2880_v23, 4  ;;  %v2286_v38 = vpop.f32.mrb[35].mxu1  ;;  %v2334_v58 = vrot.slane %v2236_v22, 5 }
 0x71d   :  { %v2308_v39 = vadd.f32 %v2306_v24, %v2230_v14  ;;  %v2317_v40 = vsel %vm1824_vm15, 0.0, %v2312_v21  ;;  %v2313_v34 = vrot.slane %v2286_v38, 6  ;;  %v2347_v42 = vrot.slane %v2286_v38, 4 }
 0x71e   :  { %v2303_v46 = vsel %vm397_vm4, %v2301_v18, %v2302_v32  ;;  %v2351_v47 = vsel %vm374_vm3, %v2348_v27, %v2350_v36 }
 0x71f   :  { %v4359_v48 = vadd.f32 %v2317_v40, %v2308_v39  ;;  %v2307_v49 = vsel %vm327_vm1, %v2303_v46, 0.0  ;;  %v2314_v43 = vsel %vm1824_vm15, %v2312_v21, %v2313_v34  ;;  %v2349_v51 = vsel %vm374_vm3, %v2347_v42, %v2348_v27 }
 0x720   :  { %v2309_v53 = vadd.f32 %v2307_v49, %v2298_v45  ;;  %v2240_v54 = vpop.f32.mrb[32].mxu0  ;;  %v2354_v2 = vsel %vm1824_vm15, 0.0, %v2349_v51  ;;  %v2493_v51 = vld [vmem:[%s4419_s16] sm:$0x1] }
 0x721   :  { %v2324_v56 = vrot.slane %v2240_v54, 6  ;;  %v2242_v57 = vpop.f32.mrb[33].mxu0  ;;  %v2366_v37 = vmul.f32 %v4359_v48, %v4359_v48 }
 0x722   :  { %v4364_v59 = vadd.f32 %v2314_v43, %v2309_v53  ;;  %v2335_v60 = vrot.slane %v2242_v57, 5  ;;  %v2244_v61 = vpop.f32.mrb[34].mxu0 }
 0x723   :  { %v2325_v63 = vsel %vm1824_vm15, %v2323_v55, %v2324_v56  ;;  %v2326_v28 = vrot.slane %v2244_v61, 6  ;;  %v2246_v41 = vpop.f32.mrb[35].mxu0 }
 0x724   :  { %v2336_v0 = vsel %vm2333_vm0, %v2334_v58, %v2335_v60  ;;  %v2337_v62 = vrot.slane %v2246_v41, 5  ;;  %v2367_v1 = vmul.f32 %v4364_v59, %v4364_v59  ;;  %v2357_v3 = vadd.f32 %v4364_v59, %v4359_v48 }
 0x725   :  { %v2341_v25 = vsel %vm397_vm4, 0.0, %v2336_v0  ;;  %v2327_v30 = vsel %vm1824_vm15, %v2324_v56, %v2326_v28 }
 0x726   :  { %v2343_v52 = vadd.f32 %v2341_v25, %v2325_v63  ;;  %v2330_v31 = vsel %vm337_vm2, %v2327_v30, 0.0  ;;  %v2338_v6 = vsel %vm2333_vm0, %v2335_v60, %v2337_v62  ;;  %v2370_v5 = vadd.f32 %v2367_v1, %v2366_v37 }
 0x727   :  { %v2342_v35 = vsel %vm327_vm1, %v2338_v6, 0.0 }
 0x728   :  { %v2355_v33 = vadd.f32 %v2354_v2, %v2343_v52  ;;  %v2344_v4 = vadd.f32 %v2342_v35, %v2330_v31 }
 0x72a   :  { %v2358_v15 = vadd.f32 %v2357_v3, %v2355_v33  ;;  %v2368_v7 = vmul.f32 %v2355_v33, %v2355_v33  ;;  %v2356_v26 = vadd.f32 %v2351_v47, %v2344_v4  ;;  %v2472_v47 = vld [vmem:[%s4418_s15] sm:$0x1] }
 0x72c   :  { %v2371_v29 = vadd.f32 %v2370_v5, %v2368_v7  ;;  %v2359_v8 = vadd.f32 %v2358_v15, %v2356_v26  ;;  %v2369_v9 = vmul.f32 %v2356_v26, %v2356_v26 }
 0x72e   :  { %v2360_v10 = vrot.slane %v2359_v8, 4  ;;  %v2372_v11 = vadd.f32 %v2371_v29, %v2369_v9 }
 0x730   :  { %v2361_v12 = vadd.f32 %v2360_v10, %v2359_v8  ;;  %v2373_v13 = vrot.slane %v2372_v11, 4 }
 0x732   :  { %v2362_v14 = vrot.slane %v2361_v12, 2  ;;  %v2374_v16 = vadd.f32 %v2373_v13, %v2372_v11 }
 0x734   :  { %v2363_v17 = vadd.f32 %v2362_v14, %v2361_v12  ;;  %v2375_v18 = vrot.slane %v2374_v16, 2 }
 0x736   :  { %v2364_v19 = vrot.slane %v2363_v17, 1  ;;  %v2376_v20 = vadd.f32 %v2375_v18, %v2374_v16 }
 0x738   :  { %v2377_v21 = vrot.slane %v2376_v20, 1  ;;  %v2365_v22 = vadd.f32 %v2364_v19, %v2363_v17 }
 0x73a   :  { %v2378_v23 = vadd.f32 %v2377_v21, %v2376_v20 }
 0x73c   :  { %v2379_v24 = vsel %vm397_vm4, %v2365_v22, %v2378_v23 }
 0x73d   :  { %2914 = vmatmul.mubr.f32.vlgmr.msra.gmra.mrb[36].mxu0 %v2379_v24 }
 0x810   :  { %v2462_v27 = vpop.f32.mrb[36].mxu0 }
 0x811   :  { %v2466_v32 = vmul.f32 %v2462_v27, %v2462_v27  ;;  %v2915_v36 = vpop.f32.mrb[37].mxu0 }
 0x813   :  { %v2468_v38 = vrot.slane %v2466_v32, 7 }
 0x815   :  { %v2470_v39 = vsub.f32 %v2462_v27, %v2468_v38 }
 0x817   :  { %v2471_v40 = vmax.f32 %v2470_v39, 0.0 }
 0x819   :  { %v2473_v34 = vadd.f32 1e-05, %v2471_v40 }
 0x81b   :  { %3265 = vrsqrt.f32 %v2473_v34 }
 0x825   :  { %v3266_v42 = vpop.eup %3265 }
 0x826   :  { %v2482_v45 = vrot.slane %v3266_v42, %v3640_v44 }
 0x828   :  { %v2483_v46 = vcombine.high %v2482_v45, %v2482_v45 }
 0x82a   :  { %v2490_v49 = vrot.slane %v2483_v46, %v3640_v44 }
 0x82c   :  { %v2492_v43 = vmul.f32 %v2490_v49, %v2472_v47 }
 0x82e   :  { %v2494_v53 = vmul.f32 %v2492_v43, %v2462_v27  ;;  %v2500_v54 = vrot.slane %v2492_v43, %v3648_v50 }
 0x830   :  { %v2495_v55 = vsub.f32 %v2493_v51, %v2494_v53  ;;  %v2502_v56 = vmul.f32 %v2500_v54, %v4359_v48  ;;  %v2503_v57 = vmul.f32 %v2500_v54, %v4364_v59  ;;  %v2504_v58 = vmul.f32 %v2500_v54, %v2355_v33 }
 0x831   :  { %v2505_v60 = vmul.f32 %v2500_v54, %v2356_v26 }
 0x832   :  { %v2510_v61 = vrot.slane %v2495_v55, %v3648_v50 }
 0x834   :  { %v2512_v63 = vadd.f32 %v2510_v61, %v2502_v56  ;;  %v2513_v28 = vadd.f32 %v2510_v61, %v2503_v57  ;;  %v2514_v44 = vadd.f32 %v2510_v61, %v2504_v58  ;;  %v2515_v41 = vadd.f32 %v2510_v61, %v2505_v60 }
 0x836   :  { %v2516_v0 = vmax.f32 %v2512_v63, 0.0  ;;  %v2517_v62 = vmax.f32 %v2513_v28, 0.0  ;;  %v2518_v25 = vmax.f32 %v2514_v44, 0.0  ;;  %v2519_v30 = vmax.f32 %v2515_v41, 0.0 }
 0x838   :  { %2520 = vst [vmem:[%s4420_s17] sm:$0xff] %v2516_v0  ;;  %2521 = vst [vmem:[%s4420_s17 + $0x8] sm:$0xff] %v2517_v62 }
 0x839   :  { %2522 = vst [vmem:[%s4420_s17 + $0x10] sm:$0xff] %v2518_v25  ;;  %2523 = vst [vmem:[%s4420_s17 + $0x18] sm:$0xff] %v2519_v30 }

</bundles_post_ra>
